<compile_context>
chip_gen: v5e
topology: v5e:2x2
jax: 0.10.0
libtpu: 0.0.40
codegen_flags: <defaults>
</compile_context>

<pallas_src>
import math

import jax
import jax.numpy as jnp
from jax.experimental import pallas as pl
from jax.experimental.pallas import tpu as pltpu

SIGMA_DATA = 1.0


# ---------------------------------------------------------------------------
# Fused kernel: nearest-neighbor 2x upsample (interleaved in-kernel) * c_in
# ---------------------------------------------------------------------------
def _upsample2x_scale_kernel(sig_ref, x_ref, colsel_ref, rowsel_ref, o_ref):
    # sig_ref    : SMEM (B,)             low_res_sigma
    # x_ref      : VMEM (1, C, TH, W)    input tile
    # colsel_ref : VMEM (W, 2W)          colsel[w, q] = 1 iff w == q // 2
    # rowsel_ref : VMEM (2TH, TH)        rowsel[p, t] = 1 iff t == p // 2
    # o_ref      : VMEM (1, C, 2TH, 2W)  fused nearest-2x upsample * c_in
    b = pl.program_id(0)
    sig = sig_ref[b]
    c_in = 1.0 / jnp.sqrt(sig * sig + SIGMA_DATA * SIGMA_DATA)

    x = x_ref[0].astype(jnp.float32) * c_in                 # (C, TH, W)
    C, TH, W = x.shape

    colsel = jnp.broadcast_to(colsel_ref[...][None], (C, W, 2 * W))
    rowsel = jnp.broadcast_to(rowsel_ref[...][None], (C, 2 * TH, TH))

    # cols[c, t, q] = x[c, t, q // 2]   (lane interleave via MXU; 0/1 weights are exact)
    cols = jnp.einsum("ctw,cwq->ctq", x, colsel,
                      precision=jax.lax.Precision.HIGHEST,
                      preferred_element_type=jnp.float32)
    # out[c, p, q] = cols[c, p // 2, q] = x[c, p // 2, q // 2]
    out = jnp.einsum("cpt,ctq->cpq", rowsel, cols,
                     precision=jax.lax.Precision.HIGHEST,
                     preferred_element_type=jnp.float32)
    o_ref[0] = out.astype(o_ref.dtype)


def _choose_tile_h(C, H, W, itemsize, budget_bytes=4 * 1024 * 1024):
    """Largest H-tile whose double-buffered in+out blocks fit the VMEM budget."""
    # per grid step ~ 2 (double buffer) * (C*TH*W + C*2TH*2W) * itemsize = 10*C*TH*W*itemsize
    valid = [t for t in range(1, H + 1) if H % t == 0 and (t == H or t % 8 == 0)]
    fits = [t for t in valid if 10 * C * t * W * itemsize <= budget_bytes]
    return max(fits) if fits else min(valid)


def _upsample2x_scale_fused(low_res, low_res_sigma, out_dtype):
    B, C, H, W = low_res.shape
    TH = _choose_tile_h(C, H, W, jnp.dtype(out_dtype).itemsize)
    # Exact 0/1 selection matrices implementing the nearest-neighbor interleave.
    colsel = (jnp.arange(W)[:, None] == (jnp.arange(2 * W)[None, :] // 2)
              ).astype(jnp.float32)                                   # (W, 2W)
    rowsel = ((jnp.arange(2 * TH)[:, None] // 2) == jnp.arange(TH)[None, :]
              ).astype(jnp.float32)                                   # (2TH, TH)
    return pl.pallas_call(
        _upsample2x_scale_kernel,
        out_shape=jax.ShapeDtypeStruct((B, C, 2 * H, 2 * W), out_dtype),
        grid=(B, H // TH),
        in_specs=[
            pl.BlockSpec(memory_space=pltpu.MemorySpace.SMEM),           # low_res_sigma
            pl.BlockSpec((1, C, TH, W), lambda b, j: (b, 0, j, 0)),      # input tile
            pl.BlockSpec((W, 2 * W), lambda b, j: (0, 0)),               # colsel
            pl.BlockSpec((2 * TH, TH), lambda b, j: (0, 0)),             # rowsel
        ],
        out_specs=pl.BlockSpec((1, C, 2 * TH, 2 * W), lambda b, j: (b, 0, j, 0)),
        compiler_params=pltpu.CompilerParams(
            dimension_semantics=("parallel", "parallel"),
            vmem_limit_bytes=32 * 1024 * 1024,
        ),
    )(low_res_sigma.astype(jnp.float32), low_res, colsel, rowsel)


# ---------------------------------------------------------------------------
# Fallback path (4 duplicates + XLA interleave). Slower but uses only the most
# basic ops; kept as a guard for toolchains that reject the in-kernel batched
# f32 einsum. Correctness-identical to the fused path.
# ---------------------------------------------------------------------------
def _upsample2x_scale_4copy_kernel(sig_ref, x_ref, o_ref):
    b = pl.program_id(0)
    sig = sig_ref[b]
    c_in = 1.0 / jnp.sqrt(sig * sig + SIGMA_DATA * SIGMA_DATA)
    scaled = x_ref[...] * c_in                               # (1, C, H, W)
    for k in range(4):                                       # k = 2*dh + dw
        o_ref[0, k] = scaled[0].astype(o_ref.dtype)


def _upsample2x_scale_4copy(low_res, low_res_sigma, out_dtype):
    B, C, H, W = low_res.shape
    out5 = pl.pallas_call(
        _upsample2x_scale_4copy_kernel,
        out_shape=jax.ShapeDtypeStruct((B, 4, C, H, W), out_dtype),
        grid=(B,),
        in_specs=[
            pl.BlockSpec(memory_space=pltpu.MemorySpace.SMEM),
            pl.BlockSpec((1, C, H, W), lambda b: (b, 0, 0, 0)),
        ],
        out_specs=pl.BlockSpec((1, 4, C, H, W), lambda b: (b, 0, 0, 0, 0)),
        compiler_params=pltpu.CompilerParams(dimension_semantics=("parallel",)),
    )(low_res_sigma.astype(jnp.float32), low_res)
    out6 = out5.reshape(B, 2, 2, C, H, W)
    return jnp.transpose(out6, (0, 3, 4, 1, 5, 2)).reshape(B, C, 2 * H, 2 * W)


def upsample2x_and_scale(low_res, low_res_sigma, out_dtype=None):
    """nearest_upsample_2x(low_res) * c_in(low_res_sigma), NCHW -> NCHW (2H, 2W).

    Pass out_dtype=jnp.bfloat16 if the downstream U-Net takes bf16: the 4x-sized
    output write dominates HBM traffic, so halving its width is ~1.8x there.
    """
    out_dtype = low_res.dtype if out_dtype is None else out_dtype
    try:
        return _upsample2x_scale_fused(low_res, low_res_sigma, out_dtype)
    except Exception:
        # Guarded fallback for older Mosaic builds (see comment above).
        return _upsample2x_scale_4copy(low_res, low_res_sigma, out_dtype)


# ---------------------------------------------------------------------------
# mapping_cond = cat([FourierFeatures(log1p(low_res_sigma)), pooler], dim=1)
# Tiny elementwise op: per the perf review a dedicated pallas_call here is pure
# launch/DMA overhead, so we let XLA fuse it.
# ---------------------------------------------------------------------------
def mapping_cond(low_res_sigma, fourier_weight, pooler):
    c_noise = jnp.log1p(low_res_sigma.astype(jnp.float32))[:, None]       # (B, 1)
    # fourier_weight has shape (embed_dim // 2, 1); in_features == 1 so
    # c_noise @ weight.T == c_noise * weight.reshape(1, -1).
    f = (2.0 * math.pi) * (c_noise * fourier_weight.reshape(1, -1))       # (B, half)
    noise_embed = jnp.concatenate([jnp.cos(f), jnp.sin(f)], axis=-1)      # (B, embed)
    return jnp.concatenate([noise_embed, pooler], axis=1)


# ---------------------------------------------------------------------------
# Module-equivalent forward
# ---------------------------------------------------------------------------
def noise_level_and_text_conditioned_upscaler(inputs, sigma, low_res,
                                              low_res_sigma, c, fourier_weight):
    cross_cond, cross_cond_padding, pooler = c
    low_res_in = upsample2x_and_scale(low_res, low_res_sigma)
    m_cond = mapping_cond(low_res_sigma, fourier_weight, pooler)
    # TODO(synk): inner_model is an external full U-Net submodule; we return its
    # fully prepared conditioned inputs instead of faking it.
    return dict(inputs=inputs, sigma=sigma, unet_cond=low_res_in,
                mapping_cond=m_cond, cross_cond=cross_cond,
                cross_cond_padding=cross_cond_padding)


if __name__ == "__main__":
    key = jax.random.PRNGKey(0)
    ks = jax.random.split(key, 8)

    B, C, H, W = 2, 4, 16, 16
    EMBED_DIM = 64        # (module default is 256; kept small for the example)
    POOLER_DIM = 32
    SEQ, HID = 8, 32

    inputs = jax.random.normal(ks[0], (B, C, 2 * H, 2 * W), jnp.float32)
    sigma = jnp.abs(jax.random.normal(ks[1], (B,), jnp.float32)) + 0.1
    low_res = jax.random.normal(ks[2], (B, C, H, W), jnp.float32)
    low_res_sigma = jnp.abs(jax.random.normal(ks[3], (B,), jnp.float32)) + 0.1
    cross_cond = jax.random.normal(ks[4], (B, SEQ, HID), jnp.float32)
    cross_cond_padding = jnp.zeros((B, SEQ), jnp.float32)
    pooler = jax.random.normal(ks[5], (B, POOLER_DIM), jnp.float32)
    # FourierFeatures(1, EMBED_DIM, std=2): weight ~ N(0, 1) * 2, shape (EMBED_DIM//2, 1)
    fourier_weight = jax.random.normal(ks[6], (EMBED_DIM // 2, 1), jnp.float32) * 2.0

    out = noise_level_and_text_conditioned_upscaler(
        inputs, sigma, low_res, low_res_sigma,
        (cross_cond, cross_cond_padding, pooler), fourier_weight)
    out = jax.tree_util.tree_map(jax.block_until_ready, out)

    # --- pure-JAX reference check ---
    c_in = 1.0 / jnp.sqrt(low_res_sigma ** 2 + SIGMA_DATA ** 2)
    up_ref = jnp.repeat(jnp.repeat(low_res, 2, axis=2), 2, axis=3) \
        * c_in[:, None, None, None]
    c_noise_ref = jnp.log1p(low_res_sigma)[:, None]
    f_ref = 2.0 * math.pi * (c_noise_ref @ fourier_weight.T)
    emb_ref = jnp.concatenate([jnp.cos(f_ref), jnp.sin(f_ref)], axis=-1)
    mc_ref = jnp.concatenate([emb_ref, pooler], axis=1)

    assert out["unet_cond"].shape == (B, C, 2 * H, 2 * W)
    assert out["mapping_cond"].shape == (B, EMBED_DIM + POOLER_DIM)
    assert jnp.allclose(out["unet_cond"], up_ref, atol=1e-5, rtol=1e-5)
    assert jnp.allclose(out["mapping_cond"], mc_ref, atol=1e-5, rtol=1e-5)

    print("KERNEL_OK")
</pallas_src>

<mosaic_0001>
module attributes {stable_mosaic.version = 11 : i64} {
  func.func @_upsample2x_scale_kernel(%arg0: i32, %arg1: i32, %arg2: memref<2xf32, #tpu.memory_space<smem>>, %arg3: memref<1x4x16x16xf32, #tpu.memory_space<vmem>>, %arg4: memref<16x32xf32, #tpu.memory_space<vmem>>, %arg5: memref<32x16xf32, #tpu.memory_space<vmem>>, %arg6: memref<1x4x32x32xf32, #tpu.memory_space<vmem>>) attributes {dimension_semantics = [#tpu.dimension_semantics<parallel>, #tpu.dimension_semantics<parallel>], iteration_bounds = array<i64: 2, 1>, scalar_prefetch = 0 : i64, scratch_operands = 0 : i64, tpu.core_type = #tpu.core_type<tc>, window_params = [{transform_indices = @transform_0, window_bounds = array<i64: 2>}, {transform_indices = @transform_1, window_bounds = array<i64: 1, 4, 16, 16>}, {pipeline_mode = #tpu.pipeline_mode<synchronous>, transform_indices = @transform_2, window_bounds = array<i64: 16, 32>}, {pipeline_mode = #tpu.pipeline_mode<synchronous>, transform_indices = @transform_3, window_bounds = array<i64: 32, 16>}, {transform_indices = @transform_4, window_bounds = array<i64: 1, 4, 32, 32>}]} {
    %0 = arith.index_cast %arg0 : i32 to index
    %1 = memref.load %arg2[%0] : memref<2xf32, #tpu.memory_space<smem>>
    %2 = arith.mulf %1, %1 : f32
    %cst = arith.constant 1.000000e+00 : f32
    %3 = arith.addf %2, %cst : f32
    %4 = math.sqrt %3 : f32
    %cst_0 = arith.constant 1.000000e+00 : f32
    %5 = arith.divf %cst_0, %4 : f32
    %c0 = arith.constant 0 : index
    %c0_1 = arith.constant 0 : index
    %c0_2 = arith.constant 0 : index
    %c0_3 = arith.constant 0 : index
    %6 = vector.load %arg3[%c0, %c0_1, %c0_2, %c0_3] : memref<1x4x16x16xf32, #tpu.memory_space<vmem>>, vector<1x4x16x16xf32>
    %7 = vector.shape_cast %6 : vector<1x4x16x16xf32> to vector<4x16x16xf32>
    %8 = vector.broadcast %5 : f32 to vector<4x16x16xf32>
    %9 = arith.mulf %7, %8 : vector<4x16x16xf32>
    %c0_4 = arith.constant 0 : index
    %c0_5 = arith.constant 0 : index
    %10 = vector.load %arg4[%c0_4, %c0_5] : memref<16x32xf32, #tpu.memory_space<vmem>>, vector<16x32xf32>
    %11 = vector.shape_cast %10 : vector<16x32xf32> to vector<1x16x32xf32>
    %12 = vector.shape_cast %11 : vector<1x16x32xf32> to vector<1x16x32xf32>
    %13 = vector.broadcast %12 : vector<1x16x32xf32> to vector<4x16x32xf32>
    %c0_6 = arith.constant 0 : index
    %c0_7 = arith.constant 0 : index
    %14 = vector.load %arg5[%c0_6, %c0_7] : memref<32x16xf32, #tpu.memory_space<vmem>>, vector<32x16xf32>
    %15 = vector.shape_cast %14 : vector<32x16xf32> to vector<1x32x16xf32>
    %16 = vector.shape_cast %15 : vector<1x32x16xf32> to vector<1x32x16xf32>
    %17 = vector.broadcast %16 : vector<1x32x16xf32> to vector<4x32x16xf32>
    "tpu.trace_start"() <{level = 10 : i32, message = "ctw,cwq->ctq"}> : () -> ()
    %cst_8 = arith.constant dense<0.000000e+00> : vector<4x16x32xf32>
    %18 = tpu.matmul %9, %13, %cst_8 {dimension_numbers = #tpu.dot_dimension_numbers<[2], [1], [1], [2], [0, 0, 0, 1, 1, 2], [0], [0]>, precision = #tpu.contract_precision<fp32>} : vector<4x16x16xf32>, vector<4x16x32xf32>, vector<4x16x32xf32> -> vector<4x16x32xf32>
    "tpu.trace_stop"() : () -> ()
    "tpu.trace_start"() <{level = 10 : i32, message = "cpt,ctq->cpq"}> : () -> ()
    %cst_9 = arith.constant dense<0.000000e+00> : vector<4x32x32xf32>
    %19 = tpu.matmul %17, %18, %cst_9 {dimension_numbers = #tpu.dot_dimension_numbers<[2], [1], [1], [2], [0, 0, 0, 1, 1, 2], [0], [0]>, precision = #tpu.contract_precision<fp32>} : vector<4x32x16xf32>, vector<4x16x32xf32>, vector<4x32x32xf32> -> vector<4x32x32xf32>
    "tpu.trace_stop"() : () -> ()
    %c0_10 = arith.constant 0 : index
    %c0_11 = arith.constant 0 : index
    %c0_12 = arith.constant 0 : index
    %c0_13 = arith.constant 0 : index
    %20 = vector.load %arg6[%c0_10, %c0_11, %c0_12, %c0_13] : memref<1x4x32x32xf32, #tpu.memory_space<vmem>>, vector<1x4x32x32xf32>
    %21 = vector.shape_cast %20 : vector<1x4x32x32xf32> to vector<4x32x32xf32>
    %22 = vector.shape_cast %19 : vector<4x32x32xf32> to vector<1x4x32x32xf32>
    tpu.vector_store %arg6[%c0_10, %c0_11, %c0_12, %c0_13], %22 {strides = array<i32>} : memref<1x4x32x32xf32, #tpu.memory_space<vmem>>, vector<1x4x32x32xf32>,
    return
  }
  func.func @transform_0(%arg0: i32, %arg1: i32) -> i32 {
    %c0_i32 = arith.constant 0 : i32
    %c0_i32_0 = arith.constant 0 : i32
    return %c0_i32 : i32
  }
  func.func @transform_1(%arg0: i32, %arg1: i32) -> (i32, i32, i32, i32) {
    %c0_i32 = arith.constant 0 : i32
    %c0_i32_0 = arith.constant 0 : i32
    %c0_i32_1 = arith.constant 0 : i32
    return %arg0, %c0_i32, %arg1, %c0_i32_0 : i32, i32, i32, i32
  }
  func.func @transform_2(%arg0: i32, %arg1: i32) -> (i32, i32) {
    %c0_i32 = arith.constant 0 : i32
    %c0_i32_0 = arith.constant 0 : i32
    %c0_i32_1 = arith.constant 0 : i32
    return %c0_i32, %c0_i32_0 : i32, i32
  }
  func.func @transform_3(%arg0: i32, %arg1: i32) -> (i32, i32) {
    %c0_i32 = arith.constant 0 : i32
    %c0_i32_0 = arith.constant 0 : i32
    %c0_i32_1 = arith.constant 0 : i32
    return %c0_i32, %c0_i32_0 : i32, i32
  }
  func.func @transform_4(%arg0: i32, %arg1: i32) -> (i32, i32, i32, i32) {
    %c0_i32 = arith.constant 0 : i32
    %c0_i32_0 = arith.constant 0 : i32
    %c0_i32_1 = arith.constant 0 : i32
    return %arg0, %c0_i32, %arg1, %c0_i32_0 : i32, i32, i32, i32
  }
}

module attributes {stable_mosaic.version = 11 : i64} {
  func.func @_upsample2x_scale_4copy_kernel(%arg0: i32, %arg1: memref<2xf32, #tpu.memory_space<smem>>, %arg2: memref<1x4x16x16xf32, #tpu.memory_space<vmem>>, %arg3: memref<1x4x4x16x16xf32, #tpu.memory_space<vmem>>) attributes {dimension_semantics = [#tpu.dimension_semantics<parallel>], iteration_bounds = array<i64: 2>, scalar_prefetch = 0 : i64, scratch_operands = 0 : i64, tpu.core_type = #tpu.core_type<tc>, window_params = [{transform_indices = @transform_0, window_bounds = array<i64: 2>}, {transform_indices = @transform_1, window_bounds = array<i64: 1, 4, 16, 16>}, {transform_indices = @transform_2, window_bounds = array<i64: 1, 4, 4, 16, 16>}]} {
    %0 = arith.index_cast %arg0 : i32 to index
    %1 = memref.load %arg1[%0] : memref<2xf32, #tpu.memory_space<smem>>
    %2 = arith.mulf %1, %1 : f32
    %cst = arith.constant 1.000000e+00 : f32
    %3 = arith.addf %2, %cst : f32
    %4 = math.sqrt %3 : f32
    %cst_0 = arith.constant 1.000000e+00 : f32
    %5 = arith.divf %cst_0, %4 : f32
    %c0 = arith.constant 0 : index
    %c0_1 = arith.constant 0 : index
    %c0_2 = arith.constant 0 : index
    %c0_3 = arith.constant 0 : index
    %6 = vector.load %arg2[%c0, %c0_1, %c0_2, %c0_3] : memref<1x4x16x16xf32, #tpu.memory_space<vmem>>, vector<1x4x16x16xf32>
    %7 = vector.broadcast %5 : f32 to vector<1x4x16x16xf32>
    %8 = arith.mulf %6, %7 : vector<1x4x16x16xf32>
    %9 = vector.shape_cast %8 : vector<1x4x16x16xf32> to vector<4x16x16xf32>
    %c0_4 = arith.constant 0 : index
    %c0_5 = arith.constant 0 : index
    %c0_6 = arith.constant 0 : index
    %c0_7 = arith.constant 0 : index
    %c0_8 = arith.constant 0 : index
    %10 = vector.load %arg3[%c0_4, %c0_5, %c0_6, %c0_7, %c0_8] : memref<1x4x4x16x16xf32, #tpu.memory_space<vmem>>, vector<1x1x4x16x16xf32>
    %11 = vector.shape_cast %10 : vector<1x1x4x16x16xf32> to vector<4x16x16xf32>
    %12 = vector.shape_cast %9 : vector<4x16x16xf32> to vector<1x1x4x16x16xf32>
    tpu.vector_store %arg3[%c0_4, %c0_5, %c0_6, %c0_7, %c0_8], %12 {strides = array<i32>} : memref<1x4x4x16x16xf32, #tpu.memory_space<vmem>>, vector<1x1x4x16x16xf32>,
    %13 = vector.shape_cast %8 : vector<1x4x16x16xf32> to vector<4x16x16xf32>
    %c0_9 = arith.constant 0 : index
    %c1 = arith.constant 1 : index
    %c0_10 = arith.constant 0 : index
    %c0_11 = arith.constant 0 : index
    %c0_12 = arith.constant 0 : index
    %14 = vector.load %arg3[%c0_9, %c1, %c0_10, %c0_11, %c0_12] : memref<1x4x4x16x16xf32, #tpu.memory_space<vmem>>, vector<1x1x4x16x16xf32>
    %15 = vector.shape_cast %14 : vector<1x1x4x16x16xf32> to vector<4x16x16xf32>
    %16 = vector.shape_cast %13 : vector<4x16x16xf32> to vector<1x1x4x16x16xf32>
    tpu.vector_store %arg3[%c0_9, %c1, %c0_10, %c0_11, %c0_12], %16 {strides = array<i32>} : memref<1x4x4x16x16xf32, #tpu.memory_space<vmem>>, vector<1x1x4x16x16xf32>,
    %17 = vector.shape_cast %8 : vector<1x4x16x16xf32> to vector<4x16x16xf32>
    %c0_13 = arith.constant 0 : index
    %c2 = arith.constant 2 : index
    %c0_14 = arith.constant 0 : index
    %c0_15 = arith.constant 0 : index
    %c0_16 = arith.constant 0 : index
    %18 = vector.load %arg3[%c0_13, %c2, %c0_14, %c0_15, %c0_16] : memref<1x4x4x16x16xf32, #tpu.memory_space<vmem>>, vector<1x1x4x16x16xf32>
    %19 = vector.shape_cast %18 : vector<1x1x4x16x16xf32> to vector<4x16x16xf32>
    %20 = vector.shape_cast %17 : vector<4x16x16xf32> to vector<1x1x4x16x16xf32>
    tpu.vector_store %arg3[%c0_13, %c2, %c0_14, %c0_15, %c0_16], %20 {strides = array<i32>} : memref<1x4x4x16x16xf32, #tpu.memory_space<vmem>>, vector<1x1x4x16x16xf32>,
    %21 = vector.shape_cast %8 : vector<1x4x16x16xf32> to vector<4x16x16xf32>
    %c0_17 = arith.constant 0 : index
    %c3 = arith.constant 3 : index
    %c0_18 = arith.constant 0 : index
    %c0_19 = arith.constant 0 : index
    %c0_20 = arith.constant 0 : index
    %22 = vector.load %arg3[%c0_17, %c3, %c0_18, %c0_19, %c0_20] : memref<1x4x4x16x16xf32, #tpu.memory_space<vmem>>, vector<1x1x4x16x16xf32>
    %23 = vector.shape_cast %22 : vector<1x1x4x16x16xf32> to vector<4x16x16xf32>
    %24 = vector.shape_cast %21 : vector<4x16x16xf32> to vector<1x1x4x16x16xf32>
    tpu.vector_store %arg3[%c0_17, %c3, %c0_18, %c0_19, %c0_20], %24 {strides = array<i32>} : memref<1x4x4x16x16xf32, #tpu.memory_space<vmem>>, vector<1x1x4x16x16xf32>,
    return
  }
  func.func @transform_0(%arg0: i32) -> i32 {
    %c0_i32 = arith.constant 0 : i32
    %c0_i32_0 = arith.constant 0 : i32
    return %c0_i32 : i32
  }
  func.func @transform_1(%arg0: i32) -> (i32, i32, i32, i32) {
    %c0_i32 = arith.constant 0 : i32
    %c0_i32_0 = arith.constant 0 : i32
    %c0_i32_1 = arith.constant 0 : i32
    %c0_i32_2 = arith.constant 0 : i32
    return %arg0, %c0_i32, %c0_i32_0, %c0_i32_1 : i32, i32, i32, i32
  }
  func.func @transform_2(%arg0: i32) -> (i32, i32, i32, i32, i32) {
    %c0_i32 = arith.constant 0 : i32
    %c0_i32_0 = arith.constant 0 : i32
    %c0_i32_1 = arith.constant 0 : i32
    %c0_i32_2 = arith.constant 0 : i32
    %c0_i32_3 = arith.constant 0 : i32
    return %arg0, %c0_i32, %c0_i32_0, %c0_i32_1, %c0_i32_2 : i32, i32, i32, i32, i32
  }
}

</mosaic_0001>

<bundles_post_ra>
// kernel: tpu_custom_call.1
= control target key start
LH: loop header
LB: loop body
LE: loop exit
PB: predicated region body
PF: predicated region fallthrough
CT: control target
= control target key end

     0   :  { %s2980_s0 = inlined_call_operand.vmem [shape: f32[2], index: 0, kind: input, shape index: {}]   ;;  %s2981_s1 = inlined_call_operand.hbm [shape: f32[2,4,16,16], index: 1, kind: input, shape index: {}]   ;;  %s2982_s2 = inlined_call_operand.vmem [shape: f32[16,32], index: 2, kind: input, shape index: {}]   ;;  %s2983_s3 = inlined_call_operand.vmem [shape: f32[32,16], index: 3, kind: input, shape index: {}]   ;;  %s2984_s4 = inlined_call_operand.hbm [shape: f32[2,4,32,32], index: 4, kind: output, shape index: {}]  }
   0x1   :  { %2987 = sst [smem:[#allocation12_spill]] %s2980_s0 }
   0x2   :  { %9 = vsyncpa [#allocation5], 0 }
   0x3   :  { %10 = vsyncpa [#allocation3], 0 }
   0x4   :  { %12 = vsyncpa [#allocation3 + $0x1], 0 }
   0x5   :  { %13 = vsyncpa [#allocation4], 0 }
   0x6   :  { %15 = vsyncpa [#allocation4 + $0x1], 0  ;;  %s2514_s15 = smov 0   ;;  %s2516_s16 = smov 0  }
   0x7   :  { %s2518_s17 = smov 0   ;;  %s2520_s18 = smov 0  }
   0x8   :  { %s2522_s19 = smov 0   ;;  %s2524_s20 = smov 0  }
   0x9 LB: > { %2988 = sst [smem:[#allocation11_spill]] %s2482_s20  ;;  %s2247_s21 = sadd.s32 4294967295, %s2482_s20   ;;  %s2482_s20 = sphi %s2524_s20, %s21_s20   ;;  %s2478_s19 = sphi %s2522_s19, %s3002_s19   ;;  %s2474_s18 = sphi %s2520_s18, %s3001_s18   ;;  %s2470_s17 = sphi %s2518_s17, %s3000_s17   ;;  %s2466_s16 = sphi %s2516_s16, %s2999_s16   ;;  %s2462_s15 = sphi %s2514_s15, %s2998_s15  }
   0xa   : > { %s2248_s22 = sadd.s32 4294967294, %s2482_s20   ;;  %s63_s23 = sadd.s32 1, %s2470_s17 }
   0xb   : > { %p70_p0 = scmp.ne.s32.totalorder %s2470_s17, %s2466_s16  ;;  %p71_p1 = scmp.eq.s32.totalorder %s2482_s20, 0 }
   0xc   : > { %p76_p2 = scmp.ne.s32.totalorder %s2466_s16, %s2462_s15  ;;  %p2552_p3 = scmp.eq.s32.totalorder %s2247_s21, 0 }
   0xd   : > { %p144_p4 = scmp.eq.s32.totalorder %s2247_s21, 1  ;;  %p2556_p5 = por %p71_p1, %p70_p0 }
   0xe   : > { %p150_p6 = scmp.eq.s32.totalorder %s2248_s22, 1  ;;  %p2562_p7 = por %p2552_p3, %p76_p2 }
   0xf   : > { %p2566_p8 = por %p144_p4, %p70_p0  ;;  %p2249_p10 = scmp.ge.s32.totalorder %s2482_s20, 1 }
  0x10   : > { %p2570_p9 = por %p150_p6, %p76_p2  ;;  %p157_p11 = scmp.lt.s32.totalorder %s2482_s20, 3 }
  0x11   : > { %s2994_s0 = sld [smem:[#allocation12_spill]]  ;;  %p2251_p13 = scmp.ge.s32.totalorder %s2482_s20, 2 }
  0x12   : > { %p2579_p12 = pnand %p2249_p10, %p157_p11  ;;  %p2291_p0 = scmp.lt.s32.totalorder %s2482_s20, 2 }
  0x13   : > { %s33_s8 = sadd.s32 1, %s2478_s19  ;;  %s186_s9 = sand.u32 1, %s2470_s17  }
  0x14   : > { %p2278_p1 = pneg %p2579_p12  ;;  %p2589_p2 = pnand %p2291_p0, %p2556_p5 }
  0x15   : > { %p35_p6 = scmp.ge.s32.totalorder %s33_s8, 2  ;;  %s2484_s10 = smov [#allocation2]  }
  0x16   : > { %p2279_p4 = pnand %p2278_p1, %p2552_p3  ;;  %s2252_s11 = sshll.u32 %s186_s9, 6 }
  0x17   : > { %s169_s5 = sshll.u32 %s2994_s0, 4  ;;  %s3004_s8 = smov (%p35_p6, %s33_s8), 0  ;;  %s170_s5 = int_to_ptr.vmem [resolvable:$true] %s169_s5 }
  0x18   : > { %2281 = dma.vmem_to_smem (!%p2279_p4), %s170_s5, 16, %s2484_s10, [#allocation5]  }
  0x19   : > { %s58_s12 = ssub.s32 %s2478_s19, %s3004_s8  ;;  %s2264_s13 = sshll.u32 %s2478_s19, 6 }
  0x1a   : > { %p61_p10 = scmp.eq.s32.totalorder %s58_s12, 0  ;;  %s197_s22 = scalar_lea.hbm %s2981_s1, %s2264_s13 }
  0x1b   : > { %s190_s25 = scalar_lea.vmem [#allocation6], %s2252_s11  ;;  %s198_s0 = sshll.u32 %s197_s22, 4  ;;  %s199_s0 = int_to_ptr.hbm [resolvable:$true] %s198_s0 }
  0x1c   : > { %s200_s29 = sshll.u32 %s190_s25, 4  ;;  %s187_s5 = scalar_lea.sflag [#allocation3], %s186_s9  ;;  %s201_s29 = int_to_ptr.vmem [resolvable:$true] %s200_s29 }
  0x1d   : > { %s2608_s30 = scalar_select %p61_p10, %s2470_s17, %s63_s23  }
  0x1e   : > { %s2485_s10 = smov 128   ;;  %s2486_s20 = smov 8  }
  0x1f   : > { %2285 = dma.hbm_to_vmem [thread:$0]  (!%p2589_p2), %s199_s0, 1024, %s201_s29, %s187_s5, %s2485_s10, %s2485_s10, %s2486_s20  }
  0x20   : > { %212 = sbr.rel (%p2579_p12) target bundleno = 695 (0x2b7), region = 36 }
  0x25   : > { %2449 = dma.done.wait (%p2552_p3), [#allocation5], 16  }
  0x26   : > { %2451 = vsyncadd (%p2552_p3), [#allocation5], 4294967280  ;;  %s2619_s23 = sand.u32 1, %s2466_s16  }
  0x27   : > { %s2257_s9 = sshll.u32 %s2619_s23, 6  ;;  %s220_s11 = scalar_lea.sflag [#allocation3], %s2619_s23 }
  0x28   : > { %s2623_s12 = scalar_lea.vmem [#allocation6], %s2257_s9 }
  0x29   : > { %2453 = dma.done.wait (%p2562_p7), %s220_s11, 1024  }
  0x2a   : > { %2455 = vsyncadd (%p2562_p7), %s220_s11, 4294966272 }
  0x2b   : > { %229 = sfence }
  0x2c   : > { %s252_s0 = sld [smem:[#allocation2 + %s2474_s18]]  ;;  %v303_v22 = vld [vmem:[%s2982_s2 + $0x8] sm:$0xff]  ;;  %v302_v24 = vld [vmem:[%s2982_s2] sm:$0xff]  ;;  %v287_v36 = vld [vmem:[%s2623_s12 + $0x10] sm:$0xff]  ;;  %vm308_vm6 = vcmask 130048   ;;  %vm2113_vm7 = vcmask 261120  }
  0x2d   : > { %v2633_v23 = vand.u32 4294901760, %v303_v22  ;;  %v2641_v26 = vand.u32 4294901760, %v302_v24  ;;  %v285_v34 = vld [vmem:[%s2623_s12] sm:$0xff]  ;;  %v286_v35 = vld [vmem:[%s2623_s12 + $0x8] sm:$0xff]  ;;  %v288_v46 = vld [vmem:[%s2623_s12 + $0x18] sm:$0xff]  ;;  %s2416_s5 = scalar_lea.hbm %s2984_s4, 256 }
  0x2f   : > { %v2639_v25 = vsub.f32 %v303_v22, %v2633_v23  ;;  %431 = vmatpush.msra.mxu3 %v2633_v23  ;;  %330 = vmatpush.msra.mxu0 %v2633_v23  ;;  %v2649_v28 = vsub.f32 %v302_v24, %v2641_v26 }
  0x31   : > { %v2646_v27 = vand.u32 4294901760, %v2639_v25  ;;  %401 = vmatpush.msra.mxu2 %v2639_v25  ;;  %433 = vmatpush.msra.mxu3 %v2641_v26  ;;  %v2657_v30 = vand.u32 4294901760, %v2649_v28 }
  0x32   : > { %s253_s20 = smul.f32 %s252_s0, %s252_s0  ;;  %332 = vmatpush.msra.mxu0 %v2641_v26  ;;  %s2258_s0 = sshll.u32 %s2619_s23, 7 }
  0x33   : > { %v367_v29 = vsub.f32 %v2639_v25, %v2646_v27  ;;  %404 = vmatpush.msra.mxu2 %v2649_v28  ;;  %v373_v32 = vsub.f32 %v2649_v28, %v2657_v30 }
  0x34   : > { %s254_s24 = sadd.f32 1.0, %s253_s20  ;;  %464 = vmatpush.msrb.mxu0 %v2646_v27  ;;  %s2894_s20 = scalar_lea.vmem [#allocation7], %s2258_s0 }
  0x35   : > { %526 = vmatpush.msrb.mxu2 %v2633_v23  ;;  %v2662_v31 = vand.u32 4294901760, %v367_v29  ;;  %v2669_v33 = vand.u32 4294901760, %v373_v32  ;;  %s2145_s13 = sshll.u32 %s2894_s20, 4  ;;  %s2146_s13 = int_to_ptr.vmem [resolvable:$true] %s2145_s13 }
  0x36   : > { %v255_v0 = vstv %s254_s24  ;;  %468 = vmatpush.msrb.mxu0 %v2657_v30  ;;  %s2265_s24 = sshll.u32 %s2474_s18, 7  ;;  %s2131_s18 = scalar_lea.sflag [#allocation4], %s2619_s23 }
  0x37   : > { %2347 = vrsqrt.f32 %v255_v0  ;;  %vm263_vm0 = vcmp.eq.f32.partialorder %v255_v0, inf  ;;  %v266_v7 = vand.u32 2147483648, %v255_v0  ;;  %vm265_vm1 = vcmp.eq.f32.partialorder %v255_v0, 0.0  ;;  %528 = vmatpush.msrb.mxu2 %v2641_v26  ;;  %369 = vmatpush.msra.mxu1 %v2662_v31  ;;  %s2144_s7 = scalar_lea.hbm %s2984_s4, %s2265_s24 }
  0x38   : > { %565 = vmatpush.msrb.mxu3 %v2662_v31  ;;  %s2147_s14 = sshll.u32 %s2144_s7, 4  ;;  %s2148_s14 = int_to_ptr.hbm [resolvable:$true] %s2147_s14 }
  0x39   : > { %375 = vmatpush.msra.mxu1 %v2669_v33 }
  0x3a   : > { %571 = vmatpush.msrb.mxu3 %v2669_v33 }
  0x3b   : > { %493 = vmatpush.msrb.mxu1 %v2633_v23 }
  0x3d   : > { %v2348_v1 = vpop.eup %2347  ;;  %495 = vmatpush.msrb.mxu1 %v2641_v26 }
  0x3e   : > { %v257_v2 = vmul.f32 %v2348_v1, %v255_v0 }
  0x40   : > { %v258_v3 = vmul.f32 %v2348_v1, %v257_v2 }
  0x42   : > { %v259_v4 = vmul.f32 0.5, %v258_v3  ;;  %v289_v3 = vld [vmem:[%s2623_s12 + $0x20] sm:$0xff] }
  0x44   : > { %v260_v5 = vsub.f32 1.5, %v259_v4 }
  0x46   : > { %v261_v6 = vmul.f32 %v2348_v1, %v260_v5 }
  0x48   : > { %v262_v8 = vmul.f32 %v261_v6, %v255_v0  ;;  %v290_v6 = vld [vmem:[%s2623_s12 + $0x28] sm:$0xff] }
  0x4a   : > { %v264_v9 = vsel %vm263_vm0, %v255_v0, %v262_v8  ;;  %v291_v8 = vld [vmem:[%s2623_s12 + $0x30] sm:$0xff] }
  0x4b   : > { %v267_v10 = vsel %vm265_vm1, %v266_v7, %v264_v9 }
  0x4c   : > { %2266 = vpush %v267_v10 }
  0x7d   : > { %s2267_s26 = spop %2266 }
  0x7e   : > { %v269_v11 = vstv %s2267_s26 }
  0x7f   : > { %2349 = vrcp.f32 %v269_v11  ;;  %v281_v15 = vand.u32 2147483648, %v269_v11  ;;  %v279_v17 = vand.u32 2147483647, %v269_v11  ;;  %vm275_vm3 = vweird.f32 %v269_v11 }
  0x81   : > { %v282_v19 = vor.u32 1.1754944e-38, %v281_v15  ;;  %vm280_vm5 = vcmp.eq.f32.partialorder %v279_v17, 8.507059e+37 }
  0x85   : > { %v2350_v12 = vpop.eup %2349 }
  0x86   : > { %v271_v13 = vmul.f32 %v2350_v12, %v269_v11  ;;  %vm276_vm2 = vweird.f32 %v2350_v12 }
  0x87   : > { %vm277_vm4 = vmor %vm275_vm3, %vm276_vm2 }
  0x88   : > { %v272_v14 = vsub.f32 1.0, %v271_v13 }
  0x8a   : > { %v273_v16 = vmul.f32 %v2350_v12, %v272_v14 }
  0x8c   : > { %v274_v18 = vadd.f32 %v2350_v12, %v273_v16  ;;  %v292_v16 = vld [vmem:[%s2623_s12 + $0x38] sm:$0xff] }
  0x8e   : > { %v278_v20 = vsel %vm277_vm4, %v2350_v12, %v274_v18 }
  0x8f   : > { %v283_v21 = vsel %vm280_vm5, %v282_v19, %v278_v20 }
  0x90   : > { %2268 = vpush %v283_v21 }
  0xc1   : > { %s2269_s21 = spop %2268 }
  0xc2   : > { %v2679_v37 = vstv %s2269_s21  ;;  %s2410_s21 = sshra.s32 %s2148_s14, 4  ;;  %s2411_s21 = int_to_ptr.hbm [resolvable:$true] %s2410_s21 }
  0xc3   : > { %v294_v38 = vmul.f32 %v2679_v37, %v285_v34  ;;  %v295_v39 = vmul.f32 %v2679_v37, %v286_v35  ;;  %v296_v40 = vmul.f32 %v2679_v37, %v287_v36  ;;  %v297_v49 = vmul.f32 %v2679_v37, %v288_v46  ;;  %s2412_s22 = scalar_lea.hbm %s2411_s21, 128  ;;  %p2417_p11 = scmp.lt.s32.totalorder %s2411_s21, %s2984_s4 }
  0xc4   : > { %v298_v4 = vmul.f32 %v2679_v37, %v289_v3  ;;  %v299_v9 = vmul.f32 %v2679_v37, %v290_v6  ;;  %v300_v10 = vmul.f32 %v2679_v37, %v291_v8  ;;  %v301_v18 = vmul.f32 %v2679_v37, %v292_v16  ;;  %v306_v3 = vld [vmem:[%s2983_s3 + $0x10] sm:$0xff]  ;;  %p2413_p3 = scmp.ne.s32.totalorder %s2411_s21, %s2412_s22  ;;  %p2418_p12 = scmp.lt.s32.totalorder %s2416_s5, %s2412_s22 }
  0xc5   : > { %v310_v41 = vsel %vm308_vm6, %v294_v38, 0  ;;  %v313_v42 = vsel %vm308_vm6, %v295_v39, 0  ;;  %v506_v43 = vsel %vm308_vm6, %v296_v40, 0  ;;  %v509_v54 = vsel %vm308_vm6, %v297_v49, 0 }
  0xc6   : > { %v333_v44 = vand.u32 4294901760, %v310_v41  ;;  %v341_v45 = vand.u32 4294901760, %v313_v42  ;;  %v529_v48 = vand.u32 4294901760, %v506_v43  ;;  %v537_v58 = vand.u32 4294901760, %v509_v54  ;;  %p2414_p5 = pnand %p2413_p3, %p2566_p8  ;;  %p2419_p0 = por %p2418_p12, %p2417_p11 }
  0xc7   : > { %v702_v5 = vsel %vm308_vm6, %v298_v4, 0  ;;  %v705_v12 = vsel %vm308_vm6, %v299_v9, 0  ;;  %v898_v13 = vsel %vm308_vm6, %v300_v10, 0  ;;  %v901_v22 = vsel %vm308_vm6, %v301_v18, 0 }
  0xc8   : > { %377 = vmatmul.f32.vlgmr.msra.gmra.mxu1 %v333_v44  ;;  %v334_v47 = vsub.f32 %v310_v41, %v333_v44  ;;  %v342_v51 = vsub.f32 %v313_v42, %v341_v45  ;;  %v530_v53 = vsub.f32 %v506_v43, %v529_v48  ;;  %v538_v61 = vsub.f32 %v509_v54, %v537_v58  ;;  %v304_v43 = vld [vmem:[%s2983_s3] sm:$0xff]  ;;  %p2415_p7 = pneg %p2414_p5 }
  0xc9   : > { %627 = vmatpush.msra.mxu1 %v2633_v23  ;;  %v725_v7 = vand.u32 4294901760, %v702_v5  ;;  %v733_v15 = vand.u32 4294901760, %v705_v12  ;;  %v921_v17 = vand.u32 4294901760, %v898_v13  ;;  %v929_v32 = vand.u32 4294901760, %v901_v22 }
  0xca   : > { %407 = vmatmul.f32.vlgmr.msra.gmra.mxu2 %v334_v47  ;;  %v335_v50 = vand.u32 4294901760, %v334_v47  ;;  %v343_v56 = vand.u32 4294901760, %v342_v51  ;;  %v531_v57 = vand.u32 4294901760, %v530_v53  ;;  %v539_v0 = vand.u32 4294901760, %v538_v61  ;;  %p2420_p1 = pnand %p2419_p0, %p2415_p7 }
  0xcb   : > { %629 = vmatpush.msra.mxu1 %v2641_v26  ;;  %660 = vmatpush.msra.mxu2 %v2646_v27  ;;  %v726_v11 = vsub.f32 %v702_v5, %v725_v7  ;;  %v734_v20 = vsub.f32 %v705_v12, %v733_v15  ;;  %v922_v21 = vsub.f32 %v898_v13, %v921_v17 }
  0xcc   : > { %437 = vmatmul.f32.vlgmr.msra.gmra.mxu3 %v335_v50  ;;  %v336_v52 = vsub.f32 %v334_v47, %v335_v50  ;;  %v344_v59 = vsub.f32 %v342_v51, %v343_v56  ;;  %v532_v60 = vsub.f32 %v530_v53, %v531_v57  ;;  %v540_v1 = vsub.f32 %v538_v61, %v539_v0 }
  0xcd   : > { %664 = vmatpush.msra.mxu2 %v2657_v30  ;;  %689 = vmatpush.msra.mxu3 %v2633_v23  ;;  %v727_v14 = vand.u32 4294901760, %v726_v11  ;;  %v735_v29 = vand.u32 4294901760, %v734_v20  ;;  %v930_v34 = vsub.f32 %v901_v22, %v929_v32  ;;  %v1094_v47 = vsel %vm308_vm6, %v304_v43, 0 }
  0xce   : > { %v337_v55 = vand.u32 4294901760, %v336_v52  ;;  %v345_v62 = vand.u32 4294901760, %v344_v59  ;;  %v533_v63 = vand.u32 4294901760, %v532_v60  ;;  %v541_v2 = vand.u32 4294901760, %v540_v1 }
  0xcf   : > { %691 = vmatpush.msra.mxu3 %v2641_v26  ;;  %v728_v19 = vsub.f32 %v726_v11, %v727_v14  ;;  %v931_v35 = vand.u32 4294901760, %v930_v34 }
  0xd0   : > { %338 = vmatmul.f32.vlgmr.msra.gmra.mxu0 %v337_v55  ;;  %381 = vmatmul.f32.gmra.mxu1 %v341_v45 }
  0xd1   : > { %597 = vmatpush.msra.mxu0 %v2639_v25  ;;  %v729_v24 = vand.u32 4294901760, %v728_v19 }
  0xd2   : > { %412 = vmatmul.f32.gmra.mxu2 %v342_v51 }
  0xd3   : > { %600 = vmatpush.msra.mxu0 %v2649_v28 }
  0xd4   : > { %443 = vmatmul.f32.gmra.mxu3 %v343_v56 }
  0xd8   : > { %346 = vmatmul.f32.gmra.mxu0 %v345_v62  ;;  %497 = vmatmul.f32.vlgmr.msrb.gmra.mxu1 %v333_v44 }
  0xd9   : > { %761 = vmatpush.msrb.mxu1 %v2662_v31 }
  0xda   : > { %534 = vmatmul.f32.vlgmr.msrb.gmra.mxu2 %v533_v63 }
  0xdb   : > { %767 = vmatpush.msrb.mxu1 %v2669_v33  ;;  %793 = vmatpush.msrb.mxu2 %v2639_v25 }
  0xdc   : > { %573 = vmatmul.f32.vlgmr.msrb.gmra.mxu3 %v529_v48 }
  0xdd   : > { %796 = vmatpush.msrb.mxu2 %v2649_v28  ;;  %823 = vmatpush.msrb.mxu3 %v2633_v23 }
  0xdf   : > { %825 = vmatpush.msrb.mxu3 %v2641_v26 }
  0xe0   : > { %470 = vmatmul.f32.vlgmr.msrb.gmra.mxu0 %v333_v44  ;;  %501 = vmatmul.f32.gmra.mxu1 %v341_v45 }
  0xe1   : > { %722 = vmatpush.msrb.mxu0 %v2633_v23 }
  0xe2   : > { %542 = vmatmul.f32.gmra.mxu2 %v541_v2 }
  0xe3   : > { %724 = vmatpush.msrb.mxu0 %v2641_v26 }
  0xe4   : > { %577 = vmatmul.f32.gmra.mxu3 %v537_v58 }
  0xe8   : > { %474 = vmatmul.f32.gmra.mxu0 %v341_v45  ;;  %633 = vmatmul.f32.vlgmr.msra.gmra.mxu1 %v531_v57 }
  0xe9   : > { %885 = vmatpush.msra.mxu1 %v2633_v23 }
  0xea   : > { %666 = vmatmul.f32.vlgmr.msra.gmra.mxu2 %v529_v48 }
  0xeb   : > { %887 = vmatpush.msra.mxu1 %v2641_v26  ;;  %918 = vmatpush.msra.mxu2 %v2633_v23 }
  0xec   : > { %693 = vmatmul.f32.vlgmr.msra.gmra.mxu3 %v529_v48  ;;  %v2738_v48 = vand.u32 4294901760, %v1094_v47 }
  0xed   : > { %920 = vmatpush.msra.mxu2 %v2641_v26  ;;  %957 = vmatpush.msra.mxu3 %v2662_v31  ;;  %v923_v31 = vand.u32 4294901760, %v922_v21 }
  0xee   : > { %v2744_v57 = vsub.f32 %v1094_v47, %v2738_v48 }
  0xef   : > { %963 = vmatpush.msra.mxu3 %v2669_v33  ;;  %v924_v33 = vsub.f32 %v922_v21, %v923_v31 }
  0xf0   : > { %603 = vmatmul.f32.vlgmr.msra.gmra.mxu0 %v530_v53  ;;  %639 = vmatmul.f32.gmra.mxu1 %v539_v0  ;;  %v305_v53 = vld [vmem:[%s2983_s3 + $0x8] sm:$0xff] }
  0xf1   : > { %856 = vmatpush.msra.mxu0 %v2646_v27  ;;  %v1097_v60 = vsel %vm308_vm6, %v305_v53, 0 }
  0xf2   : > { %670 = vmatmul.f32.gmra.mxu2 %v537_v58  ;;  %v2750_v62 = vand.u32 4294901760, %v1097_v60 }
  0xf3   : > { %860 = vmatpush.msra.mxu0 %v2657_v30 }
  0xf4   : > { %697 = vmatmul.f32.gmra.mxu3 %v537_v58  ;;  %v2760_v8 = vsub.f32 %v1097_v60, %v2750_v62 }
  0xf8   : > { %608 = vmatmul.f32.gmra.mxu0 %v538_v61  ;;  %769 = vmatmul.f32.vlgmr.msrb.gmra.mxu1 %v725_v7  ;;  %v2748_v61 = vand.u32 4294901760, %v2744_v57 }
  0xf9   : > { %1019 = vmatpush.msrb.mxu1 %v2633_v23 }
  0xfa   : > { %799 = vmatmul.f32.vlgmr.msrb.gmra.mxu2 %v726_v11  ;;  %v1100_v11 = vsel %vm308_vm6, %v306_v3, 0 }
  0xfb   : > { %1021 = vmatpush.msrb.mxu1 %v2641_v26  ;;  %1052 = vmatpush.msrb.mxu2 %v2646_v27  ;;  %v736_v27 = vsub.f32 %v734_v20, %v735_v29 }
  0xfc   : > { %829 = vmatmul.f32.vlgmr.msrb.gmra.mxu3 %v727_v14  ;;  %v2767_v14 = vand.u32 4294901760, %v2760_v8 }
  0xfd   : > { %1056 = vmatpush.msrb.mxu2 %v2657_v30  ;;  %1081 = vmatpush.msrb.mxu3 %v2633_v23  ;;  %v737_v30 = vand.u32 4294901760, %v736_v27  ;;  %v925_v23 = vand.u32 4294901760, %v924_v33 }
  0xff   : > { %1083 = vmatpush.msrb.mxu3 %v2641_v26  ;;  %v932_v26 = vsub.f32 %v930_v34, %v931_v35 }
 0x100   : > { %730 = vmatmul.f32.vlgmr.msrb.gmra.mxu0 %v729_v24  ;;  %773 = vmatmul.f32.gmra.mxu1 %v733_v15 }
 0x101   : > { %989 = vmatpush.msrb.mxu0 %v2639_v25  ;;  %v933_v36 = vand.u32 4294901760, %v932_v26 }
 0x102   : > { %804 = vmatmul.f32.gmra.mxu2 %v734_v20 }
 0x103   : > { %992 = vmatpush.msrb.mxu0 %v2649_v28 }
 0x104   : > { %835 = vmatmul.f32.gmra.mxu3 %v735_v29 }
 0x108   : > { %738 = vmatmul.f32.gmra.mxu0 %v737_v30  ;;  %889 = vmatmul.f32.vlgmr.msra.gmra.mxu1 %v725_v7 }
 0x10a   : > { %926 = vmatmul.f32.vlgmr.msra.gmra.mxu2 %v925_v23 }
 0x10c   : > { %965 = vmatmul.f32.vlgmr.msra.gmra.mxu3 %v921_v17 }
 0x110   : > { %862 = vmatmul.f32.vlgmr.msra.gmra.mxu0 %v725_v7  ;;  %893 = vmatmul.f32.gmra.mxu1 %v733_v15  ;;  %v1126_v7 = vsub.f32 %v2744_v57, %v2748_v61 }
 0x112   : > { %934 = vmatmul.f32.gmra.mxu2 %v933_v36  ;;  %v2764_v13 = vand.u32 4294901760, %v1126_v7 }
 0x114   : > { %969 = vmatmul.f32.gmra.mxu3 %v929_v32 }
 0x118   : > { %866 = vmatmul.f32.gmra.mxu0 %v733_v15  ;;  %1025 = vmatmul.f32.vlgmr.msrb.gmra.mxu1 %v923_v31  ;;  %v2769_v15 = vand.u32 4294901760, %v1100_v11 }
 0x11a   : > { %1058 = vmatmul.f32.vlgmr.msrb.gmra.mxu2 %v921_v17  ;;  %v2780_v27 = vsub.f32 %v1100_v11, %v2769_v15 }
 0x11c   : > { %1085 = vmatmul.f32.vlgmr.msrb.gmra.mxu3 %v921_v17 }
 0x120   : > { %995 = vmatmul.f32.vlgmr.msrb.gmra.mxu0 %v922_v21  ;;  %1031 = vmatmul.f32.gmra.mxu1 %v931_v35  ;;  %v307_v21 = vld [vmem:[%s2983_s3 + $0x18] sm:$0xff] }
 0x121   : > { %v1103_v23 = vsel %vm308_vm6, %v307_v21, 0 }
 0x122   : > { %1062 = vmatmul.f32.gmra.mxu2 %v929_v32 }
 0x124   : > { %1089 = vmatmul.f32.gmra.mxu3 %v929_v32  ;;  %v1134_v32 = vsub.f32 %v2760_v8, %v2767_v14 }
 0x126   : > { %v2785_v36 = vand.u32 4294901760, %v1134_v32 }
 0x128   : > { %1000 = vmatmul.f32.gmra.mxu0 %v930_v34 }
 0x145   : > { %v378_v25 = vpop.f32.mrf.mxu1 }
 0x14d   : > { %v339_v28 = vpop.f32.mrf.mxu0  ;;  %v382_v37 = vpop.f32.mrf.mxu1 }
 0x14e   : > { %v408_v38 = vpop.f32.mrf.mxu2  ;;  %v379_v40 = vadd.f32 %v378_v25, %v339_v28  ;;  %v2788_v25 = vand.u32 4294901760, %v2780_v27  ;;  %v2790_v28 = vand.u32 4294901760, %v1103_v23 }
 0x14f   : > { %v438_v39 = vpop.f32.mrf.mxu3 }
 0x150   : > { %v409_v46 = vadd.f32 %v408_v38, %v379_v40 }
 0x152   : > { %v439_v49 = vadd.f32 %v438_v39, %v409_v46  ;;  %v2797_v46 = vsub.f32 %v1103_v23, %v2790_v28 }
 0x155   : > { %v347_v41 = vpop.f32.mrf.mxu0  ;;  %v498_v42 = vpop.f32.mrf.mxu1 }
 0x156   : > { %v413_v44 = vpop.f32.mrf.mxu2  ;;  %v383_v50 = vadd.f32 %v382_v37, %v347_v41 }
 0x157   : > { %v444_v45 = vpop.f32.mrf.mxu3 }
 0x158   : > { %v414_v58 = vadd.f32 %v413_v44, %v383_v50 }
 0x15a   : > { %v445_v63 = vadd.f32 %v444_v45, %v414_v58  ;;  %v1142_v45 = vsub.f32 %v2780_v27, %v2788_v25 }
 0x15d   : > { %v471_v51 = vpop.f32.mrf.mxu0  ;;  %v502_v52 = vpop.f32.mrf.mxu1 }
 0x15e   : > { %v472_v54 = vadd.f32 %v471_v51, %v439_v49  ;;  %v535_v55 = vpop.f32.mrf.mxu2  ;;  %v2802_v51 = vand.u32 4294901760, %v1142_v45 }
 0x15f   : > { %v574_v56 = vpop.f32.mrf.mxu3 }
 0x160   : > { %v499_v59 = vadd.f32 %v498_v42, %v472_v54  ;;  %v575_v16 = vadd.f32 %v574_v56, %v535_v55 }
 0x162   : > { %v2752_v0 = vand.u32 4294901760, %v499_v59 }
 0x164   : > { %v1177_v10 = vsub.f32 %v499_v59, %v2752_v0 }
 0x165   : > { %v475_v1 = vpop.f32.mrf.mxu0  ;;  %v634_v2 = vpop.f32.mrf.mxu1 }
 0x166   : > { %v476_v4 = vadd.f32 %v475_v1, %v445_v63  ;;  %v543_v5 = vpop.f32.mrf.mxu2  ;;  %v1178_v18 = vand.u32 4294901760, %v1177_v10 }
 0x167   : > { %v578_v6 = vpop.f32.mrf.mxu3 }
 0x168   : > { %v503_v9 = vadd.f32 %v502_v52, %v476_v4  ;;  %v1179_v30 = vsub.f32 %v1177_v10, %v1178_v18  ;;  %v579_v37 = vadd.f32 %v578_v6, %v543_v5  ;;  %v2805_v52 = vand.u32 4294901760, %v2797_v46 }
 0x16a   : > { %v1119_v12 = vand.u32 4294901760, %v503_v9  ;;  %v1180_v38 = vand.u32 4294901760, %v1179_v30  ;;  %v1150_v63 = vsub.f32 %v2797_v46, %v2805_v52 }
 0x16c   : > { %v1171_v17 = vsub.f32 %v503_v9, %v1119_v12  ;;  %1120 = vmatpush.msra.mxu0 %v1119_v12  ;;  %1255 = vmatpush.msra.mxu3 %v1119_v12  ;;  %v2813_v3 = vand.u32 4294901760, %v1150_v63 }
 0x16d   : > { %v604_v19 = vpop.f32.mrf.mxu0  ;;  %v640_v20 = vpop.f32.mrf.mxu1 }
 0x16e   : > { %v605_v22 = vadd.f32 %v604_v19, %v575_v16  ;;  %v667_v24 = vpop.f32.mrf.mxu2  ;;  %1122 = vmatpush.msra.mxu0 %v2752_v0  ;;  %1215 = vmatpush.msra.mxu2 %v1171_v17  ;;  %v1172_v29 = vand.u32 4294901760, %v1171_v17 }
 0x16f   : > { %1257 = vmatpush.msra.mxu3 %v2752_v0  ;;  %v694_v31 = vpop.f32.mrf.mxu3  ;;  %1128 = vmatmul.f32.vlgmr.msra.gmra.mxu0 %v2764_v13 }
 0x170   : > { %v635_v33 = vadd.f32 %v634_v2, %v605_v22  ;;  %1261 = vmatmul.f32.vlgmr.msra.gmra.mxu3 %v2748_v61  ;;  %1218 = vmatpush.msra.mxu2 %v1177_v10  ;;  %v1173_v34 = vsub.f32 %v1171_v17, %v1172_v29 }
 0x171   : > { %1300 = vmatpush.msrb.mxu0 %v1172_v29  ;;  %1221 = vmatmul.f32.vlgmr.msra.gmra.mxu2 %v2744_v57 }
 0x172   : > { %v668_v35 = vadd.f32 %v667_v24, %v635_v33  ;;  %v1174_v26 = vand.u32 4294901760, %v1173_v34 }
 0x173   : > { %1304 = vmatpush.msrb.mxu0 %v1178_v18 }
 0x174   : > { %1175 = vmatpush.msra.mxu1 %v1174_v26  ;;  %v695_v39 = vadd.f32 %v694_v31, %v668_v35 }
 0x175   : > { %v609_v40 = vpop.f32.mrf.mxu0  ;;  %v770_v41 = vpop.f32.mrf.mxu1 }
 0x176   : > { %v610_v42 = vadd.f32 %v609_v40, %v579_v37  ;;  %v671_v43 = vpop.f32.mrf.mxu2  ;;  %1181 = vmatpush.msra.mxu1 %v1180_v38  ;;  %v1373_v49 = vand.u32 4294901760, %v695_v39 }
 0x177   : > { %v698_v44 = vpop.f32.mrf.mxu3  ;;  %1136 = vmatmul.f32.gmra.mxu0 %v2785_v36  ;;  %1183 = vmatmul.f32.vlgmr.msra.gmra.mxu1 %v2738_v48 }
 0x178   : > { %v641_v47 = vadd.f32 %v640_v20, %v610_v42  ;;  %1267 = vmatmul.f32.gmra.mxu3 %v2767_v14  ;;  %1337 = vmatpush.msrb.mxu1 %v1119_v12  ;;  %v1429_v54 = vsub.f32 %v695_v39, %v1373_v49 }
 0x179   : > { %1226 = vmatmul.f32.gmra.mxu2 %v2760_v8 }
 0x17a   : > { %v672_v50 = vadd.f32 %v671_v43, %v641_v47  ;;  %1339 = vmatpush.msrb.mxu1 %v2752_v0  ;;  %v1430_v1 = vand.u32 4294901760, %v1429_v54 }
 0x17c   : > { %v699_v53 = vadd.f32 %v698_v44, %v672_v50  ;;  %v1431_v7 = vsub.f32 %v1429_v54, %v1430_v1 }
 0x17d   : > { %v731_v55 = vpop.f32.mrf.mxu0  ;;  %v774_v59 = vpop.f32.mrf.mxu1 }
 0x17e   : > { %v1371_v56 = vand.u32 4294901760, %v699_v53  ;;  %v800_v58 = vpop.f32.mrf.mxu2  ;;  %v771_v4 = vadd.f32 %v770_v41, %v731_v55  ;;  %v1432_v17 = vand.u32 4294901760, %v1431_v7 }
 0x17f   : > { %v830_v60 = vpop.f32.mrf.mxu3  ;;  %1144 = vmatmul.f32.gmra.mxu0 %v2802_v51  ;;  %1187 = vmatmul.f32.gmra.mxu1 %v2750_v62 }
 0x180   : > { %v1423_v0 = vsub.f32 %v699_v53, %v1371_v56  ;;  %1273 = vmatmul.f32.gmra.mxu3 %v2788_v25  ;;  %1372 = vmatpush.msrb.mxu2 %v1371_v56  ;;  %v801_v12 = vadd.f32 %v800_v58, %v771_v4 }
 0x181   : > { %1507 = vmatpush.msra.mxu1 %v1371_v56  ;;  %1231 = vmatmul.f32.gmra.mxu2 %v2780_v27 }
 0x182   : > { %1374 = vmatpush.msrb.mxu2 %v1373_v49  ;;  %1467 = vmatpush.msra.mxu0 %v1423_v0  ;;  %v1424_v2 = vand.u32 4294901760, %v1423_v0  ;;  %v831_v18 = vadd.f32 %v830_v60, %v801_v12 }
 0x183   : > { %1509 = vmatpush.msra.mxu1 %v1373_v49 }
 0x184   : > { %1470 = vmatpush.msra.mxu0 %v1429_v54  ;;  %1552 = vmatpush.msra.mxu2 %v1424_v2  ;;  %v1425_v5 = vsub.f32 %v1423_v0, %v1424_v2 }
 0x185   : > { %v739_v6 = vpop.f32.mrf.mxu0  ;;  %v890_v16 = vpop.f32.mrf.mxu1 }
 0x186   : > { %v805_v9 = vpop.f32.mrf.mxu2  ;;  %1556 = vmatpush.msra.mxu2 %v1430_v1  ;;  %v1426_v10 = vand.u32 4294901760, %v1425_v5  ;;  %v775_v19 = vadd.f32 %v774_v59, %v739_v6 }
 0x187   : > { %v836_v11 = vpop.f32.mrf.mxu3  ;;  %1152 = vmatmul.f32.gmra.mxu0 %v2813_v3  ;;  %1191 = vmatmul.f32.gmra.mxu1 %v2769_v15 }
 0x188   : > { %1279 = vmatmul.f32.gmra.mxu3 %v2805_v52  ;;  %v806_v29 = vadd.f32 %v805_v9, %v775_v19 }
 0x189   : > { %1427 = vmatpush.msrb.mxu3 %v1426_v10  ;;  %1236 = vmatmul.f32.gmra.mxu2 %v2797_v46 }
 0x18a   : > { %v837_v33 = vadd.f32 %v836_v11, %v806_v29 }
 0x18b   : > { %1433 = vmatpush.msrb.mxu3 %v1432_v17 }
 0x18d   : > { %1589 = vmatpush.msra.mxu3 %v1371_v56  ;;  %v863_v20 = vpop.f32.mrf.mxu0  ;;  %v894_v32 = vpop.f32.mrf.mxu1 }
 0x18e   : > { %v864_v21 = vadd.f32 %v863_v20, %v831_v18  ;;  %v927_v22 = vpop.f32.mrf.mxu2 }
 0x18f   : > { %1591 = vmatpush.msra.mxu3 %v1373_v49  ;;  %v966_v24 = vpop.f32.mrf.mxu3  ;;  %1195 = vmatmul.f32.gmra.mxu1 %v2790_v28 }
 0x190   : > { %1306 = vmatmul.f32.vlgmr.msrb.gmra.mxu0 %v2738_v48  ;;  %v891_v31 = vadd.f32 %v890_v16, %v864_v21  ;;  %1435 = vmatmul.f32.vlgmr.msrb.gmra.mxu3 %v2738_v48  ;;  %v967_v40 = vadd.f32 %v966_v24, %v927_v22 }
 0x191   : > { %1380 = vmatmul.f32.vlgmr.msrb.gmra.mxu2 %v2764_v13 }
 0x192   : > { %v2823_v34 = vand.u32 4294901760, %v891_v31 }
 0x194   : > { %v1681_v38 = vsub.f32 %v891_v31, %v2823_v34 }
 0x195   : > { %v867_v30 = vpop.f32.mrf.mxu0  ;;  %v1026_v43 = vpop.f32.mrf.mxu1 }
 0x196   : > { %v868_v23 = vadd.f32 %v867_v30, %v837_v33  ;;  %v935_v35 = vpop.f32.mrf.mxu2  ;;  %v1682_v42 = vand.u32 4294901760, %v1681_v38 }
 0x197   : > { %v970_v26 = vpop.f32.mrf.mxu3  ;;  %1341 = vmatmul.f32.vlgmr.msrb.gmra.mxu1 %v2738_v48 }
 0x198   : > { %1310 = vmatmul.f32.gmra.mxu0 %v2750_v62  ;;  %v895_v37 = vadd.f32 %v894_v32, %v868_v23  ;;  %1439 = vmatmul.f32.gmra.mxu3 %v2750_v62  ;;  %v1683_v54 = vsub.f32 %v1681_v38, %v1682_v42  ;;  %v971_v59 = vadd.f32 %v970_v26, %v935_v35 }
 0x199   : > { %1388 = vmatmul.f32.gmra.mxu2 %v2785_v36 }
 0x19a   : > { %v1623_v39 = vand.u32 4294901760, %v895_v37  ;;  %v1684_v60 = vand.u32 4294901760, %v1683_v54 }
 0x19c   : > { %v1675_v41 = vsub.f32 %v895_v37, %v1623_v39  ;;  %1624 = vmatpush.msrb.mxu0 %v1623_v39  ;;  %1759 = vmatpush.msrb.mxu3 %v1623_v39 }
 0x19d   : > { %v996_v44 = vpop.f32.mrf.mxu0  ;;  %v1032_v2 = vpop.f32.mrf.mxu1 }
 0x19e   : > { %v997_v45 = vadd.f32 %v996_v44, %v967_v40  ;;  %1626 = vmatpush.msrb.mxu0 %v2823_v34  ;;  %1719 = vmatpush.msrb.mxu2 %v1675_v41  ;;  %v1676_v47 = vand.u32 4294901760, %v1675_v41  ;;  %v1059_v49 = vpop.f32.mrf.mxu2 }
 0x19f   : > { %1761 = vmatpush.msrb.mxu3 %v2823_v34  ;;  %1345 = vmatmul.f32.gmra.mxu1 %v2750_v62  ;;  %v1086_v55 = vpop.f32.mrf.mxu3 }
 0x1a0   : > { %1314 = vmatmul.f32.gmra.mxu0 %v2769_v15  ;;  %v1027_v50 = vadd.f32 %v1026_v43, %v997_v45  ;;  %1443 = vmatmul.f32.gmra.mxu3 %v2769_v15  ;;  %v1677_v53 = vsub.f32 %v1675_v41, %v1676_v47 }
 0x1a1   : > { %1722 = vmatpush.msrb.mxu2 %v1681_v38 }
 0x1a2   : > { %v1060_v56 = vadd.f32 %v1059_v49, %v1027_v50  ;;  %1396 = vmatmul.f32.gmra.mxu2 %v2802_v51  ;;  %v1678_v58 = vand.u32 4294901760, %v1677_v53 }
 0x1a4   : > { %1679 = vmatpush.msrb.mxu1 %v1678_v58  ;;  %v1087_v63 = vadd.f32 %v1086_v55, %v1060_v56 }
 0x1a5   : > { %v1001_v0 = vpop.f32.mrf.mxu0 }
 0x1a6   : > { %v1002_v1 = vadd.f32 %v1001_v0, %v971_v59  ;;  %1685 = vmatpush.msrb.mxu1 %v1684_v60  ;;  %v1877_v5 = vand.u32 4294901760, %v1087_v63  ;;  %v1063_v6 = vpop.f32.mrf.mxu2 }
 0x1a7   : > { %1349 = vmatmul.f32.gmra.mxu1 %v2769_v15  ;;  %v1090_v9 = vpop.f32.mrf.mxu3 }
 0x1a8   : > { %1318 = vmatmul.f32.gmra.mxu0 %v2790_v28  ;;  %v1033_v4 = vadd.f32 %v1032_v2, %v1002_v1  ;;  %1447 = vmatmul.f32.gmra.mxu3 %v2790_v28  ;;  %v1933_v11 = vsub.f32 %v1087_v63, %v1877_v5 }
 0x1aa   : > { %v1064_v7 = vadd.f32 %v1063_v6, %v1033_v4  ;;  %1404 = vmatmul.f32.gmra.mxu2 %v2813_v3  ;;  %v1934_v17 = vand.u32 4294901760, %v1933_v11 }
 0x1ac   : > { %v1091_v10 = vadd.f32 %v1090_v9, %v1064_v7  ;;  %v1935_v20 = vsub.f32 %v1933_v11, %v1934_v17 }
 0x1ae   : > { %v1875_v12 = vand.u32 4294901760, %v1091_v10  ;;  %v1936_v22 = vand.u32 4294901760, %v1935_v20 }
 0x1af   : > { %1353 = vmatmul.f32.gmra.mxu1 %v2790_v28 }
 0x1b0   : > { %1473 = vmatmul.f32.vlgmr.msra.gmra.mxu0 %v2744_v57  ;;  %v1927_v16 = vsub.f32 %v1091_v10, %v1875_v12  ;;  %1593 = vmatmul.f32.vlgmr.msra.gmra.mxu3 %v2738_v48 }
 0x1b1   : > { %1804 = vmatpush.msra.mxu0 %v1676_v47 }
 0x1b2   : > { %v1928_v18 = vand.u32 4294901760, %v1927_v16  ;;  %1558 = vmatmul.f32.vlgmr.msra.gmra.mxu2 %v2738_v48 }
 0x1b3   : > { %1808 = vmatpush.msra.mxu0 %v1682_v42  ;;  %1876 = vmatpush.msra.mxu2 %v1875_v12 }
 0x1b4   : > { %v1929_v19 = vsub.f32 %v1927_v16, %v1928_v18 }
 0x1b5   : > { %1878 = vmatpush.msra.mxu2 %v1877_v5 }
 0x1b6   : > { %v1930_v21 = vand.u32 4294901760, %v1929_v19 }
 0x1b7   : > { %1513 = vmatmul.f32.vlgmr.msra.gmra.mxu1 %v2748_v61 }
 0x1b8   : > { %1478 = vmatmul.f32.gmra.mxu0 %v2760_v8  ;;  %1597 = vmatmul.f32.gmra.mxu3 %v2750_v62 }
 0x1b9   : > { %1841 = vmatpush.msra.mxu1 %v1623_v39  ;;  %1931 = vmatpush.msra.mxu3 %v1930_v21 }
 0x1ba   : > { %1562 = vmatmul.f32.gmra.mxu2 %v2750_v62 }
 0x1bb   : > { %1843 = vmatpush.msra.mxu1 %v2823_v34  ;;  %1937 = vmatpush.msra.mxu3 %v1936_v22 }
 0x1bf   : > { %1519 = vmatmul.f32.gmra.mxu1 %v2767_v14 }
 0x1c0   : > { %1483 = vmatmul.f32.gmra.mxu0 %v2780_v27  ;;  %1601 = vmatmul.f32.gmra.mxu3 %v2769_v15 }
 0x1c2   : > { %1566 = vmatmul.f32.gmra.mxu2 %v2769_v15 }
 0x1c7   : > { %1525 = vmatmul.f32.gmra.mxu1 %v2788_v25 }
 0x1c8   : > { %1488 = vmatmul.f32.gmra.mxu0 %v2797_v46  ;;  %1605 = vmatmul.f32.gmra.mxu3 %v2790_v28 }
 0x1ca   : > { %1570 = vmatmul.f32.gmra.mxu2 %v2790_v28 }
 0x1cf   : > { %1531 = vmatmul.f32.gmra.mxu1 %v2805_v52 }
 0x1d0   : > { %1632 = vmatmul.f32.vlgmr.msrb.gmra.mxu0 %v2764_v13  ;;  %1765 = vmatmul.f32.vlgmr.msrb.gmra.mxu3 %v2748_v61 }
 0x1d1   : > { %1971 = vmatpush.msrb.mxu0 %v1927_v16  ;;  %2093 = vmatpush.msrb.mxu3 %v1875_v12 }
 0x1d2   : > { %1725 = vmatmul.f32.vlgmr.msrb.gmra.mxu2 %v2744_v57 }
 0x1d3   : > { %1974 = vmatpush.msrb.mxu0 %v1933_v11  ;;  %2056 = vmatpush.msrb.mxu2 %v1928_v18 }
 0x1d4   : > { %2095 = vmatpush.msrb.mxu3 %v1877_v5 }
 0x1d5   : > { %2060 = vmatpush.msrb.mxu2 %v1934_v17 }
 0x1d7   : > { %1687 = vmatmul.f32.vlgmr.msrb.gmra.mxu1 %v2738_v48 }
 0x1d8   : > { %1640 = vmatmul.f32.gmra.mxu0 %v2785_v36  ;;  %1771 = vmatmul.f32.gmra.mxu3 %v2767_v14 }
 0x1d9   : > { %2011 = vmatpush.msrb.mxu1 %v1875_v12 }
 0x1da   : > { %1730 = vmatmul.f32.gmra.mxu2 %v2760_v8 }
 0x1db   : > { %2013 = vmatpush.msrb.mxu1 %v1877_v5 }
 0x1df   : > { %1691 = vmatmul.f32.gmra.mxu1 %v2750_v62 }
 0x1e0   : > { %1648 = vmatmul.f32.gmra.mxu0 %v2802_v51  ;;  %1777 = vmatmul.f32.gmra.mxu3 %v2788_v25 }
 0x1e2   : > { %1735 = vmatmul.f32.gmra.mxu2 %v2780_v27 }
 0x1e7   : > { %1695 = vmatmul.f32.gmra.mxu1 %v2769_v15 }
 0x1e8   : > { %1656 = vmatmul.f32.gmra.mxu0 %v2813_v3  ;;  %1783 = vmatmul.f32.gmra.mxu3 %v2805_v52 }
 0x1ea   : > { %1740 = vmatmul.f32.gmra.mxu2 %v2797_v46 }
 0x1ec   : > { %v1129_v24 = vpop.f32.mrf.mxu0 }
 0x1ef   : > { %1699 = vmatmul.f32.gmra.mxu1 %v2790_v28 }
 0x1f0   : > { %1810 = vmatmul.f32.vlgmr.msra.gmra.mxu0 %v2738_v48  ;;  %1939 = vmatmul.f32.vlgmr.msra.gmra.mxu3 %v2738_v48 }
 0x1f2   : > { %1884 = vmatmul.f32.vlgmr.msra.gmra.mxu2 %v2764_v13 }
 0x1f3   : > { %v1262_v29 = vpop.f32.mrf.mxu3 }
 0x1f4   : > { %v1137_v31 = vpop.f32.mrf.mxu0  ;;  %v1184_v32 = vpop.f32.mrf.mxu1 }
 0x1f5   : > { %v1222_v33 = vpop.f32.mrf.mxu2 }
 0x1f7   : > { %1845 = vmatmul.f32.vlgmr.msra.gmra.mxu1 %v2738_v48 }
 0x1f8   : > { %1814 = vmatmul.f32.gmra.mxu0 %v2750_v62  ;;  %1943 = vmatmul.f32.gmra.mxu3 %v2750_v62 }
 0x1fa   : > { %1892 = vmatmul.f32.gmra.mxu2 %v2785_v36  ;;  %v1185_v36 = vadd.f32 %v1184_v32, %v1129_v24 }
 0x1fb   : > { %v1268_v34 = vpop.f32.mrf.mxu3 }
 0x1fc   : > { %v1145_v30 = vpop.f32.mrf.mxu0  ;;  %v1188_v23 = vpop.f32.mrf.mxu1  ;;  %v1223_v42 = vadd.f32 %v1222_v33, %v1185_v36 }
 0x1fd   : > { %v1227_v35 = vpop.f32.mrf.mxu2  ;;  %v1189_v44 = vadd.f32 %v1188_v23, %v1137_v31 }
 0x1ff   : > { %1849 = vmatmul.f32.gmra.mxu1 %v2750_v62  ;;  %v1228_v54 = vadd.f32 %v1227_v35, %v1189_v44 }
 0x200   : > { %1818 = vmatmul.f32.gmra.mxu0 %v2769_v15  ;;  %1947 = vmatmul.f32.gmra.mxu3 %v2769_v15 }
 0x202   : > { %1900 = vmatmul.f32.gmra.mxu2 %v2802_v51  ;;  %v1263_v51 = vadd.f32 %v1262_v29, %v1223_v42 }
 0x203   : > { %v1274_v13 = vpop.f32.mrf.mxu3 }
 0x204   : > { %v1153_v26 = vpop.f32.mrf.mxu0  ;;  %v1192_v37 = vpop.f32.mrf.mxu1 }
 0x205   : > { %v1232_v38 = vpop.f32.mrf.mxu2 }
 0x207   : > { %1853 = vmatmul.f32.gmra.mxu1 %v2769_v15 }
 0x208   : > { %1822 = vmatmul.f32.gmra.mxu0 %v2790_v28  ;;  %1951 = vmatmul.f32.gmra.mxu3 %v2790_v28 }
 0x20a   : > { %1908 = vmatmul.f32.gmra.mxu2 %v2813_v3 }
 0x20b   : > { %v1280_v39 = vpop.f32.mrf.mxu3 }
 0x20c   : > { %v1196_v40 = vpop.f32.mrf.mxu1 }
 0x20d   : > { %v1307_v41 = vpop.f32.mrf.mxu0  ;;  %v1237_v43 = vpop.f32.mrf.mxu2 }
 0x20e   : > { %v1308_v45 = vadd.f32 %v1307_v41, %v1263_v51 }
 0x20f   : > { %1857 = vmatmul.f32.gmra.mxu1 %v2790_v28 }
 0x210   : > { %1977 = vmatmul.f32.vlgmr.msrb.gmra.mxu0 %v2744_v57  ;;  %2097 = vmatmul.f32.vlgmr.msrb.gmra.mxu3 %v2738_v48  ;;  %v1193_v57 = vadd.f32 %v1192_v37, %v1145_v30 }
 0x212   : > { %2062 = vmatmul.f32.vlgmr.msrb.gmra.mxu2 %v2738_v48  ;;  %v1269_v48 = vadd.f32 %v1268_v34, %v1228_v54  ;;  %v1233_v63 = vadd.f32 %v1232_v38, %v1193_v57 }
 0x213   : > { %v1436_v47 = vpop.f32.mrf.mxu3 }
 0x214   : > { %v1342_v3 = vpop.f32.mrf.mxu1 }
 0x215   : > { %v1311_v49 = vpop.f32.mrf.mxu0  ;;  %v1343_v50 = vadd.f32 %v1342_v3, %v1308_v45  ;;  %v1381_v53 = vpop.f32.mrf.mxu2 }
 0x216   : > { %v1312_v56 = vadd.f32 %v1311_v49, %v1269_v48 }
 0x217   : > { %2114 = vst.msk [vmem:[%s2894_s20] sm:$0xff] %vm2113_vm7, %v1343_v50  ;;  %2017 = vmatmul.f32.vlgmr.msrb.gmra.mxu1 %v2748_v61  ;;  %v1275_v61 = vadd.f32 %v1274_v13, %v1233_v63 }
 0x218   : > { %1982 = vmatmul.f32.gmra.mxu0 %v2760_v8  ;;  %2101 = vmatmul.f32.gmra.mxu3 %v2750_v62  ;;  %v1197_v8 = vadd.f32 %v1196_v40, %v1153_v26 }
 0x21a   : > { %2066 = vmatmul.f32.gmra.mxu2 %v2750_v62  ;;  %v1238_v6 = vadd.f32 %v1237_v43, %v1197_v8 }
 0x21b   : > { %v1440_v55 = vpop.f32.mrf.mxu3 }
 0x21c   : > { %v1346_v59 = vpop.f32.mrf.mxu1 }
 0x21d   : > { %v1315_v58 = vpop.f32.mrf.mxu0  ;;  %v1389_v60 = vpop.f32.mrf.mxu2  ;;  %v1347_v0 = vadd.f32 %v1346_v59, %v1312_v56 }
 0x21e   : > { %v1316_v1 = vadd.f32 %v1315_v58, %v1275_v61  ;;  %v1441_v21 = vadd.f32 %v1440_v55, %v1389_v60 }
 0x21f   : > { %2115 = vst.msk [vmem:[%s2894_s20 + $0x8] sm:$0xff] %vm2113_vm7, %v1347_v0  ;;  %2023 = vmatmul.f32.gmra.mxu1 %v2767_v14  ;;  %v1281_v14 = vadd.f32 %v1280_v39, %v1238_v6 }
 0x220   : > { %1987 = vmatmul.f32.gmra.mxu0 %v2780_v27  ;;  %2105 = vmatmul.f32.gmra.mxu3 %v2769_v15 }
 0x222   : > { %2070 = vmatmul.f32.gmra.mxu2 %v2769_v15 }
 0x223   : > { %v1444_v62 = vpop.f32.mrf.mxu3 }
 0x224   : > { %v1350_v4 = vpop.f32.mrf.mxu1 }
 0x225   : > { %v1319_v2 = vpop.f32.mrf.mxu0  ;;  %v1397_v5 = vpop.f32.mrf.mxu2  ;;  %v1351_v7 = vadd.f32 %v1350_v4, %v1316_v1 }
 0x226   : > { %v1320_v27 = vadd.f32 %v1319_v2, %v1281_v14  ;;  %v1445_v30 = vadd.f32 %v1444_v62, %v1397_v5 }
 0x227   : > { %2116 = vst.msk [vmem:[%s2894_s20 + $0x10] sm:$0xff] %vm2113_vm7, %v1351_v7  ;;  %2029 = vmatmul.f32.gmra.mxu1 %v2788_v25 }
 0x228   : > { %1992 = vmatmul.f32.gmra.mxu0 %v2797_v46  ;;  %2109 = vmatmul.f32.gmra.mxu3 %v2790_v28  ;;  %v1437_v46 = vadd.f32 %v1436_v47, %v1381_v53 }
 0x22a   : > { %2074 = vmatmul.f32.gmra.mxu2 %v2790_v28 }
 0x22b   : > { %v1448_v15 = vpop.f32.mrf.mxu3 }
 0x22c   : > { %v1354_v10 = vpop.f32.mrf.mxu1 }
 0x22d   : > { %v1474_v9 = vpop.f32.mrf.mxu0  ;;  %v1405_v11 = vpop.f32.mrf.mxu2  ;;  %v1355_v12 = vadd.f32 %v1354_v10, %v1320_v27 }
 0x22e   : > { %v1475_v17 = vadd.f32 %v1474_v9, %v1437_v46  ;;  %v1449_v40 = vadd.f32 %v1448_v15, %v1405_v11 }
 0x22f   : > { %2117 = vst.msk [vmem:[%s2894_s20 + $0x18] sm:$0xff] %vm2113_vm7, %v1355_v12  ;;  %2035 = vmatmul.f32.gmra.mxu1 %v2805_v52 }
 0x233   : > { %v1594_v16 = vpop.f32.mrf.mxu3 }
 0x234   : > { %v1514_v18 = vpop.f32.mrf.mxu1 }
 0x235   : > { %v1479_v25 = vpop.f32.mrf.mxu0  ;;  %v1559_v19 = vpop.f32.mrf.mxu2  ;;  %v1515_v20 = vadd.f32 %v1514_v18, %v1475_v17 }
 0x236   : > { %v1480_v29 = vadd.f32 %v1479_v25, %v1441_v21 }
 0x237   : > { %v1560_v28 = vadd.f32 %v1559_v19, %v1515_v20 }
 0x239   : > { %v1595_v22 = vadd.f32 %v1594_v16, %v1560_v28 }
 0x23b   : > { %v1598_v24 = vpop.f32.mrf.mxu3  ;;  %2118 = vst.msk [vmem:[%s2894_s20 + $0x20] sm:$0xff] %vm2113_vm7, %v1595_v22 }
 0x23c   : > { %v1520_v32 = vpop.f32.mrf.mxu1 }
 0x23d   : > { %v1484_v31 = vpop.f32.mrf.mxu0  ;;  %v1563_v33 = vpop.f32.mrf.mxu2  ;;  %v1521_v34 = vadd.f32 %v1520_v32, %v1480_v29 }
 0x23e   : > { %v1485_v13 = vadd.f32 %v1484_v31, %v1445_v30 }
 0x23f   : > { %v1564_v52 = vadd.f32 %v1563_v33, %v1521_v34 }
 0x241   : > { %v1599_v23 = vadd.f32 %v1598_v24, %v1564_v52 }
 0x243   : > { %v1602_v35 = vpop.f32.mrf.mxu3  ;;  %2119 = vst.msk [vmem:[%s2894_s20 + $0x28] sm:$0xff] %vm2113_vm7, %v1599_v23 }
 0x244   : > { %v1526_v37 = vpop.f32.mrf.mxu1 }
 0x245   : > { %v1489_v26 = vpop.f32.mrf.mxu0  ;;  %v1567_v38 = vpop.f32.mrf.mxu2  ;;  %v1527_v36 = vadd.f32 %v1526_v37, %v1485_v13 }
 0x246   : > { %v1490_v43 = vadd.f32 %v1489_v26, %v1449_v40 }
 0x247   : > { %v1568_v39 = vadd.f32 %v1567_v38, %v1527_v36 }
 0x249   : > { %v1603_v41 = vadd.f32 %v1602_v35, %v1568_v39 }
 0x24b   : > { %v1606_v42 = vpop.f32.mrf.mxu3  ;;  %2120 = vst.msk [vmem:[%s2894_s20 + $0x30] sm:$0xff] %vm2113_vm7, %v1603_v41 }
 0x24c   : > { %v1532_v44 = vpop.f32.mrf.mxu1 }
 0x24d   : > { %v1633_v51 = vpop.f32.mrf.mxu0  ;;  %v1571_v45 = vpop.f32.mrf.mxu2  ;;  %v1533_v47 = vadd.f32 %v1532_v44, %v1490_v43 }
 0x24f   : > { %v1572_v49 = vadd.f32 %v1571_v45, %v1533_v47 }
 0x251   : > { %v1607_v3 = vadd.f32 %v1606_v42, %v1572_v49 }
 0x253   : > { %v1766_v50 = vpop.f32.mrf.mxu3  ;;  %2121 = vst.msk [vmem:[%s2894_s20 + $0x38] sm:$0xff] %vm2113_vm7, %v1607_v3 }
 0x254   : > { %v1688_v54 = vpop.f32.mrf.mxu1 }
 0x255   : > { %v1641_v53 = vpop.f32.mrf.mxu0  ;;  %v1726_v48 = vpop.f32.mrf.mxu2  ;;  %v1689_v61 = vadd.f32 %v1688_v54, %v1633_v51 }
 0x257   : > { %v1727_v4 = vadd.f32 %v1726_v48, %v1689_v61 }
 0x259   : > { %v1767_v5 = vadd.f32 %v1766_v50, %v1727_v4 }
 0x25b   : > { %v1772_v57 = vpop.f32.mrf.mxu3 }
 0x25c   : > { %v1692_v56 = vpop.f32.mrf.mxu1 }
 0x25d   : > { %v1649_v55 = vpop.f32.mrf.mxu0  ;;  %v1731_v58 = vpop.f32.mrf.mxu2  ;;  %v1693_v6 = vadd.f32 %v1692_v56, %v1641_v53 }
 0x25f   : > { %v1732_v10 = vadd.f32 %v1731_v58, %v1693_v6 }
 0x261   : > { %v1773_v12 = vadd.f32 %v1772_v57, %v1732_v10 }
 0x263   : > { %v1778_v59 = vpop.f32.mrf.mxu3 }
 0x264   : > { %v1696_v63 = vpop.f32.mrf.mxu1 }
 0x265   : > { %v1657_v60 = vpop.f32.mrf.mxu0  ;;  %v1736_v0 = vpop.f32.mrf.mxu2  ;;  %v1697_v46 = vadd.f32 %v1696_v63, %v1649_v55 }
 0x267   : > { %v1737_v20 = vadd.f32 %v1736_v0, %v1697_v46 }
 0x269   : > { %v1779_v21 = vadd.f32 %v1778_v59, %v1737_v20 }
 0x26b   : > { %v1784_v8 = vpop.f32.mrf.mxu3 }
 0x26c   : > { %v1700_v1 = vpop.f32.mrf.mxu1 }
 0x26d   : > { %v1811_v62 = vpop.f32.mrf.mxu0  ;;  %v1741_v2 = vpop.f32.mrf.mxu2  ;;  %v1701_v22 = vadd.f32 %v1700_v1, %v1657_v60 }
 0x26e   : > { %v1812_v14 = vadd.f32 %v1811_v62, %v1767_v5 }
 0x26f   : > { %v1742_v34 = vadd.f32 %v1741_v2, %v1701_v22 }
 0x271   : > { %v1785_v30 = vadd.f32 %v1784_v8, %v1742_v34 }
 0x273   : > { %v1940_v7 = vpop.f32.mrf.mxu3 }
 0x274   : > { %v1846_v27 = vpop.f32.mrf.mxu1 }
 0x275   : > { %v1815_v15 = vpop.f32.mrf.mxu0  ;;  %v1885_v9 = vpop.f32.mrf.mxu2  ;;  %v1847_v11 = vadd.f32 %v1846_v27, %v1812_v14 }
 0x276   : > { %v1816_v17 = vadd.f32 %v1815_v15, %v1773_v12  ;;  %v1941_v36 = vadd.f32 %v1940_v7, %v1885_v9 }
 0x277   : > { %2122 = vst.msk [vmem:[%s2894_s20 + $0x40] sm:$0xff] %vm2113_vm7, %v1847_v11 }
 0x27b   : > { %v1944_v16 = vpop.f32.mrf.mxu3 }
 0x27c   : > { %v1850_v18 = vpop.f32.mrf.mxu1 }
 0x27d   : > { %v1819_v25 = vpop.f32.mrf.mxu0  ;;  %v1893_v19 = vpop.f32.mrf.mxu2  ;;  %v1851_v28 = vadd.f32 %v1850_v18, %v1816_v17 }
 0x27e   : > { %v1820_v29 = vadd.f32 %v1819_v25, %v1779_v21  ;;  %v1945_v45 = vadd.f32 %v1944_v16, %v1893_v19 }
 0x27f   : > { %2123 = vst.msk [vmem:[%s2894_s20 + $0x48] sm:$0xff] %vm2113_vm7, %v1851_v28 }
 0x283   : > { %v1948_v24 = vpop.f32.mrf.mxu3 }
 0x284   : > { %v1854_v32 = vpop.f32.mrf.mxu1 }
 0x285   : > { %v1823_v31 = vpop.f32.mrf.mxu0  ;;  %v1901_v33 = vpop.f32.mrf.mxu2  ;;  %v1855_v52 = vadd.f32 %v1854_v32, %v1820_v29 }
 0x286   : > { %v1824_v35 = vadd.f32 %v1823_v31, %v1785_v30  ;;  %v1949_v55 = vadd.f32 %v1948_v24, %v1901_v33 }
 0x287   : > { %2124 = vst.msk [vmem:[%s2894_s20 + $0x50] sm:$0xff] %vm2113_vm7, %v1855_v52 }
 0x28b   : > { %v1952_v23 = vpop.f32.mrf.mxu3 }
 0x28c   : > { %v1858_v26 = vpop.f32.mrf.mxu1 }
 0x28d   : > { %v1978_v13 = vpop.f32.mrf.mxu0  ;;  %v1909_v37 = vpop.f32.mrf.mxu2  ;;  %v1859_v38 = vadd.f32 %v1858_v26, %v1824_v35 }
 0x28e   : > { %v1979_v40 = vadd.f32 %v1978_v13, %v1941_v36  ;;  %v1953_v62 = vadd.f32 %v1952_v23, %v1909_v37 }
 0x28f   : > { %2125 = vst.msk [vmem:[%s2894_s20 + $0x58] sm:$0xff] %vm2113_vm7, %v1859_v38 }
 0x293   : > { %v2098_v39 = vpop.f32.mrf.mxu3 }
 0x294   : > { %v2018_v42 = vpop.f32.mrf.mxu1 }
 0x295   : > { %v1983_v41 = vpop.f32.mrf.mxu0  ;;  %v2063_v43 = vpop.f32.mrf.mxu2  ;;  %v2019_v51 = vadd.f32 %v2018_v42, %v1979_v40 }
 0x296   : > { %v1984_v3 = vadd.f32 %v1983_v41, %v1945_v45 }
 0x297   : > { %v2064_v44 = vadd.f32 %v2063_v43, %v2019_v51 }
 0x299   : > { %v2099_v47 = vadd.f32 %v2098_v39, %v2064_v44 }
 0x29b   : > { %v2102_v49 = vpop.f32.mrf.mxu3  ;;  %2126 = vst.msk [vmem:[%s2894_s20 + $0x60] sm:$0xff] %vm2113_vm7, %v2099_v47 }
 0x29c   : > { %v2024_v50 = vpop.f32.mrf.mxu1 }
 0x29d   : > { %v2067_v53 = vpop.f32.mrf.mxu2  ;;  %v2025_v54 = vadd.f32 %v2024_v50, %v1984_v3  ;;  %v1988_v48 = vpop.f32.mrf.mxu0 }
 0x29e   : > { %v1989_v58 = vadd.f32 %v1988_v48, %v1949_v55 }
 0x29f   : > { %v2068_v57 = vadd.f32 %v2067_v53, %v2025_v54 }
 0x2a1   : > { %v2103_v56 = vadd.f32 %v2102_v49, %v2068_v57 }
 0x2a3   : > { %2127 = vst.msk [vmem:[%s2894_s20 + $0x68] sm:$0xff] %vm2113_vm7, %v2103_v56  ;;  %v2106_v59 = vpop.f32.mrf.mxu3 }
 0x2a4   : > { %v2030_v60 = vpop.f32.mrf.mxu1 }
 0x2a5   : > { %v2071_v63 = vpop.f32.mrf.mxu2  ;;  %v2031_v0 = vadd.f32 %v2030_v60, %v1989_v58  ;;  %v1993_v8 = vpop.f32.mrf.mxu0 }
 0x2a6   : > { %v1994_v2 = vadd.f32 %v1993_v8, %v1953_v62 }
 0x2a7   : > { %v2072_v61 = vadd.f32 %v2071_v63, %v2031_v0 }
 0x2a9   : > { %v2107_v1 = vadd.f32 %v2106_v59, %v2072_v61 }
 0x2ab   : > { %2128 = vst.msk [vmem:[%s2894_s20 + $0x70] sm:$0xff] %vm2113_vm7, %v2107_v1  ;;  %v2110_v7 = vpop.f32.mrf.mxu3 }
 0x2ac   : > { %v2036_v4 = vpop.f32.mrf.mxu1 }
 0x2ad   : > { %v2075_v5 = vpop.f32.mrf.mxu2  ;;  %v2037_v6 = vadd.f32 %v2036_v4, %v1994_v2 }
 0x2af   : > { %v2076_v14 = vadd.f32 %v2075_v5, %v2037_v6 }
 0x2b1   : > { %v2111_v15 = vadd.f32 %v2110_v7, %v2076_v14 }
 0x2b3   : > { %2129 = vst.msk [vmem:[%s2894_s20 + $0x78] sm:$0xff] %vm2113_vm7, %v2111_v15 }
 0x2b4   : > { %2423 = shalt.err (!%p2420_p1)
}
 0x2b5   : > { %s2487_s23 = smov 128   ;;  %s2488_s11 = smov 8  }
 0x2b6   : > { %2276 = dma.vmem_to_hbm [thread:$0]  (%p2566_p8), %s2146_s13, 2048, %s2148_s14, %s2131_s18, %s2487_s23, %s2487_s23, %s2488_s11  }
 0x2b7 PF: > { %s2997_s12 = sld [smem:[#allocation11_spill]]  ;;  %s2162_s0 = sand.u32 1, %s2462_s15  }
 0x2b8   : > { %p2287_p2 = pnand %p2251_p13, %p2570_p9  ;;  %s2163_s20 = scalar_lea.sflag [#allocation4], %s2162_s0 }
 0x2ba   : > { %p2288_p4 = pneg %p2287_p2 }
 0x2bc   : > { %2457 = dma.done.wait (%p2288_p4), %s2163_s20, 2048  }
 0x2bd   : > { %2459 = vsyncadd (%p2288_p4), %s2163_s20, 4294965248  ;;  %s21_s20 = sadd.s32 1, %s2997_s12   ;;  %s2998_s15 = smov %s2466_s16 }
 0x2be   : > { %p18_p6 = scmp.ge.s32.totalorder %s21_s20, 4   ;;  %s2999_s16 = smov %s2470_s17 }
 0x2bf   : > { %s3000_s17 = smov %s2608_s30  ;;  %s3001_s18 = smov %s2478_s19 }
 0x2c0   : > { %s3002_s19 = smov %s3004_s8  ;;  %20 = sbr.rel (!%p18_p6) target bundleno = 9 (0x9), region = 86 }
 0x2c5   :  { %2169 = vsyncpa [#allocation3], 1 }
 0x2c6   :  { %2171 = vsyncpa [#allocation3 + $0x1], 1 }
 0x2c7   :  { %2172 = vsyncpa [#allocation4], 1 }
 0x2c8   :  { %2174 = vsyncpa [#allocation4 + $0x1], 1 }
 0x2c9   :  { %2175 = vsyncpa [#allocation5], 1 }
 0x2ca   :  { %2177 = vsyncpa [#allocation5 + $0x1], 1 }

// kernel: tpu_custom_call.1
= control target key start
LH: loop header
LB: loop body
LE: loop exit
PB: predicated region body
PF: predicated region fallthrough
CT: control target
= control target key end

     0   :  { %7 = vsyncpa [#allocation5], 0  ;;  %s834_s0 = inlined_call_operand.hbm [shape: f32[2], index: 0, kind: input, shape index: {}]   ;;  %s835_s1 = inlined_call_operand.hbm [shape: f32[2,4,16,16], index: 1, kind: input, shape index: {}]   ;;  %s836_s2 = inlined_call_operand.hbm [shape: f32[2,4,4,16,16], index: 2, kind: output, shape index: {}]  }
   0x1   :  { %8 = vsyncpa [#allocation3], 0 }
   0x2   :  { %10 = vsyncpa [#allocation3 + $0x1], 0 }
   0x3   :  { %11 = vsyncpa [#allocation4], 0 }
   0x4   :  { %13 = vsyncpa [#allocation4 + $0x1], 0  ;;  %s613_s9 = smov 0   ;;  %s615_s10 = smov 0  }
   0x5   :  { %s617_s11 = smov 0   ;;  %s619_s12 = smov 0  }
   0x6 LB: > { %s634_s13 = sadd.s32 4294967295, %s591_s12   ;;  %s365_s14 = sadd.s32 4294967294, %s591_s12   ;;  %s591_s12 = sphi %s619_s12, %s847_s12   ;;  %s587_s11 = sphi %s617_s11, %s846_s11   ;;  %s583_s10 = sphi %s615_s10, %s845_s10   ;;  %s579_s9 = sphi %s613_s9, %s844_s9  }
   0x7   : > { %s638_s15 = sadd.s32 1, %s591_s12   ;;  %s47_s16 = sadd.s32 1, %s587_s11 }
   0x8   : > { %s44_s17 = ssub.s32 %s591_s12, %s638_s15  ;;  %p54_p0 = scmp.ne.s32.totalorder %s587_s11, %s583_s10 }
   0x9   : > { %p45_p1 = scmp.eq.s32.totalorder %s44_s17, 0  ;;  %p55_p2 = scmp.eq.s32.totalorder %s591_s12, 0 }
   0xa   : > { %p60_p3 = scmp.ne.s32.totalorder %s583_s10, %s579_s9  ;;  %p61_p4 = scmp.eq.s32.totalorder %s634_s13, 0 }
   0xb   : > { %s650_s18 = scalar_select %p45_p1, %s587_s11, %s47_s16  }
   0xc   : > { %p652_p5 = por %p55_p2, %p54_p0  ;;  %p658_p6 = por %p61_p4, %p60_p3 }
   0xd   : > { %p84_p7 = scmp.eq.s32.totalorder %s634_s13, 1  ;;  %p90_p8 = scmp.eq.s32.totalorder %s365_s14, 1 }
   0xe   : > { %p366_p9 = scmp.ge.s32.totalorder %s591_s12, 1  ;;  %p97_p10 = scmp.lt.s32.totalorder %s591_s12, 3 }
   0xf   : > { %p665_p11 = por %p84_p7, %p54_p0  ;;  %p669_p12 = por %p90_p8, %p60_p3 }
  0x10   : > { %p673_p13 = pnand %p366_p9, %p97_p10  ;;  %s109_s26 = sshll.u32 %s834_s0, 4  ;;  %s110_s26 = int_to_ptr.hbm [resolvable:$true] %s109_s26 }
  0x11   : > { %p432_p2 = scmp.lt.s32.totalorder %s591_s12, 2  ;;  %s120_s27 = sand.u32 1, %s587_s11  }
  0x12   : > { %p419_p1 = pneg %p673_p13  ;;  %s369_s29 = sshll.u32 %s120_s27, 6 }
  0x13   : > { %p689_p3 = pnand %p432_p2, %p652_p5  ;;  %s593_s30 = smov [#allocation2]  }
  0x14   : > { %p420_p7 = pnand %p419_p1, %p61_p4  ;;  %s405_s3 = sshll.u32 %s591_s12, 6 }
  0x15   : > { %s124_s4 = scalar_lea.vmem [#allocation6], %s369_s29  ;;  %s129_s8 = scalar_lea.hbm %s835_s1, %s405_s3 }
  0x16   : > { %422 = dma.hbm_to_smem (!%p420_p7), %s110_s26, 16, %s593_s30, [#allocation5]  }
  0x17   : > { %s132_s5 = sshll.u32 %s124_s4, 4  ;;  %s130_s14 = sshll.u32 %s129_s8, 4  ;;  %s133_s5 = int_to_ptr.vmem [resolvable:$true] %s132_s5  ;;  %s131_s14 = int_to_ptr.hbm [resolvable:$true] %s130_s14 }
  0x18   : > { %s121_s16 = scalar_lea.sflag [#allocation3], %s120_s27  ;;  %s491_s17 = sshra.s32 %s131_s14, 4  ;;  %s492_s17 = int_to_ptr.hbm [resolvable:$true] %s491_s17 }
  0x19   : > { %s493_s19 = scalar_lea.hbm %s492_s17, 64  ;;  %p495_p8 = pneg %p689_p3 }
  0x1a   : > { %p494_p5 = scmp.ne.s32.totalorder %s492_s17, %s493_s19  ;;  %s498_s26 = scalar_lea.hbm %s835_s1, 128 }
  0x1b   : > { %p499_p1 = scmp.lt.s32.totalorder %s492_s17, %s835_s1  ;;  %p500_p2 = scmp.lt.s32.totalorder %s498_s26, %s493_s19 }
  0x1c   : > { %p496_p9 = pnand %p495_p8, %p494_p5 }
  0x1d   : > { %p501_p7 = por %p500_p2, %p499_p1 }
  0x1e   : > { %p497_p10 = pneg %p496_p9 }
  0x20   : > { %p502_p0 = pnand %p501_p7, %p497_p10 }
  0x22   : > { %505 = shalt.err (!%p502_p0)
}
  0x23   : > { %s594_s27 = smov 128   ;;  %s595_s3 = smov 8  }
  0x24   : > { %426 = dma.hbm_to_vmem [thread:$0]  (!%p689_p3), %s131_s14, 1024, %s133_s5, %s121_s16, %s594_s27, %s594_s27, %s595_s3  }
  0x25   : > { %144 = sbr.rel (%p673_p13) target bundleno = 237 (0xed), region = 28 }
  0x2a   : > { %566 = dma.done.wait (%p61_p4), [#allocation5], 16  }
  0x2b   : > { %568 = vsyncadd (%p61_p4), [#allocation5], 4294967280  ;;  %s714_s4 = sand.u32 1, %s583_s10  }
  0x2c   : > { %s374_s6 = sshll.u32 %s714_s4, 6  ;;  %s152_s7 = scalar_lea.sflag [#allocation3], %s714_s4 }
  0x2d   : > { %s718_s8 = scalar_lea.vmem [#allocation6], %s374_s6 }
  0x2e   : > { %570 = dma.done.wait (%p658_p6), %s152_s7, 1024  }
  0x2f   : > { %572 = vsyncadd (%p658_p6), %s152_s7, 4294966272 }
  0x30   : > { %161 = sfence }
  0x31   : > { %s178_s23 = sld [smem:[#allocation2 + %s634_s13]]  ;;  %s375_s14 = sshll.u32 %s714_s4, 8  ;;  %v211_v22 = vld [vmem:[%s718_s8] sm:$0xff]  ;;  %v212_v23 = vld [vmem:[%s718_s8 + $0x8] sm:$0xff]  ;;  %v213_v24 = vld [vmem:[%s718_s8 + $0x10] sm:$0xff]  ;;  %vm228_vm6 = vcmask 130048  }
  0x32   : > { %v214_v25 = vld [vmem:[%s718_s8 + $0x18] sm:$0xff]  ;;  %v215_v26 = vld [vmem:[%s718_s8 + $0x20] sm:$0xff]  ;;  %v216_v28 = vld [vmem:[%s718_s8 + $0x28] sm:$0xff]  ;;  %s734_s17 = scalar_lea.vmem [#allocation7], %s375_s14  ;;  %s406_s19 = sshll.u32 %s634_s13, 8 }
  0x33   : > { %v217_v32 = vld [vmem:[%s718_s8 + $0x30] sm:$0xff]  ;;  %v218_v34 = vld [vmem:[%s718_s8 + $0x38] sm:$0xff]  ;;  %s276_s26 = scalar_lea.hbm %s836_s2, %s406_s19  ;;  %s277_s13 = sshll.u32 %s734_s17, 4  ;;  %s278_s13 = int_to_ptr.vmem [resolvable:$true] %s277_s13 }
  0x34   : > { %s279_s29 = sshll.u32 %s276_s26, 4  ;;  %s265_s30 = scalar_lea.sflag [#allocation4], %s714_s4  ;;  %s280_s29 = int_to_ptr.hbm [resolvable:$true] %s279_s29 }
  0x35   : > { %s535_s27 = sshra.s32 %s280_s29, 4  ;;  %s541_s8 = scalar_lea.hbm %s836_s2, 512  ;;  %s536_s27 = int_to_ptr.hbm [resolvable:$true] %s535_s27 }
  0x36   : > { %s537_s3 = scalar_lea.hbm %s536_s27, 256  ;;  %p542_p0 = scmp.lt.s32.totalorder %s536_s27, %s836_s2 }
  0x37   : > { %s179_s28 = smul.f32 %s178_s23, %s178_s23  ;;  %p538_p4 = scmp.ne.s32.totalorder %s536_s27, %s537_s3 }
  0x38   : > { %p543_p3 = scmp.lt.s32.totalorder %s541_s8, %s537_s3 }
  0x39   : > { %s180_s5 = sadd.f32 1.0, %s179_s28  ;;  %p539_p6 = pnand %p538_p4, %p665_p11 }
  0x3a   : > { %p544_p5 = por %p543_p3, %p542_p0 }
  0x3b   : > { %v181_v0 = vstv %s180_s5  ;;  %p540_p13 = pneg %p539_p6 }
  0x3c   : > { %472 = vrsqrt.f32 %v181_v0  ;;  %vm189_vm0 = vcmp.eq.f32.partialorder %v181_v0, inf  ;;  %v192_v7 = vand.u32 2147483648, %v181_v0  ;;  %vm191_vm1 = vcmp.eq.f32.partialorder %v181_v0, 0.0 }
  0x3d   : > { %p545_p8 = pnand %p544_p5, %p540_p13 }
  0x42   : > { %v473_v1 = vpop.eup %472 }
  0x43   : > { %v183_v2 = vmul.f32 %v473_v1, %v181_v0 }
  0x45   : > { %v184_v3 = vmul.f32 %v473_v1, %v183_v2 }
  0x47   : > { %v185_v4 = vmul.f32 0.5, %v184_v3 }
  0x49   : > { %v186_v5 = vsub.f32 1.5, %v185_v4 }
  0x4b   : > { %v187_v6 = vmul.f32 %v473_v1, %v186_v5 }
  0x4d   : > { %v188_v8 = vmul.f32 %v187_v6, %v181_v0 }
  0x4f   : > { %v190_v9 = vsel %vm189_vm0, %v181_v0, %v188_v8 }
  0x50   : > { %v193_v10 = vsel %vm191_vm1, %v192_v7, %v190_v9 }
  0x51   : > { %407 = vpush %v193_v10 }
  0x82   : > { %s408_s20 = spop %407 }
  0x83   : > { %v195_v11 = vstv %s408_s20 }
  0x84   : > { %474 = vrcp.f32 %v195_v11  ;;  %v207_v15 = vand.u32 2147483648, %v195_v11  ;;  %v205_v17 = vand.u32 2147483647, %v195_v11  ;;  %vm201_vm3 = vweird.f32 %v195_v11 }
  0x86   : > { %v208_v19 = vor.u32 1.1754944e-38, %v207_v15  ;;  %vm206_vm5 = vcmp.eq.f32.partialorder %v205_v17, 8.507059e+37 }
  0x8a   : > { %v475_v12 = vpop.eup %474 }
  0x8b   : > { %v197_v13 = vmul.f32 %v475_v12, %v195_v11  ;;  %vm202_vm2 = vweird.f32 %v475_v12 }
  0x8c   : > { %vm203_vm4 = vmor %vm201_vm3, %vm202_vm2 }
  0x8d   : > { %v198_v14 = vsub.f32 1.0, %v197_v13 }
  0x8f   : > { %v199_v16 = vmul.f32 %v475_v12, %v198_v14 }
  0x91   : > { %v200_v18 = vadd.f32 %v475_v12, %v199_v16 }
  0x93   : > { %v204_v20 = vsel %vm203_vm4, %v475_v12, %v200_v18 }
  0x94   : > { %v209_v21 = vsel %vm206_vm5, %v208_v19, %v204_v20 }
  0x95   : > { %409 = vpush %v209_v21 }
  0xc6   : > { %s410_s16 = spop %409 }
  0xc7   : > { %v219_v27 = vstv %s410_s16 }
  0xc8   : > { %v220_v29 = vmul.f32 %v219_v27, %v211_v22  ;;  %v221_v30 = vmul.f32 %v219_v27, %v212_v23  ;;  %v222_v31 = vmul.f32 %v219_v27, %v213_v24  ;;  %v223_v33 = vmul.f32 %v219_v27, %v214_v25 }
  0xc9   : > { %v224_v35 = vmul.f32 %v219_v27, %v215_v26  ;;  %v225_v36 = vmul.f32 %v219_v27, %v216_v28  ;;  %v226_v37 = vmul.f32 %v219_v27, %v217_v32  ;;  %v227_v38 = vmul.f32 %v219_v27, %v218_v34 }
  0xca   : > { %229 = vst.msk [vmem:[%s734_s17] sm:$0xff] %vm228_vm6, %v220_v29 }
  0xcb   : > { %230 = vst.msk [vmem:[%s734_s17 + $0x8] sm:$0xff] %vm228_vm6, %v221_v30 }
  0xcc   : > { %231 = vst.msk [vmem:[%s734_s17 + $0x10] sm:$0xff] %vm228_vm6, %v222_v31 }
  0xcd   : > { %232 = vst.msk [vmem:[%s734_s17 + $0x18] sm:$0xff] %vm228_vm6, %v223_v33 }
  0xce   : > { %233 = vst.msk [vmem:[%s734_s17 + $0x20] sm:$0xff] %vm228_vm6, %v224_v35 }
  0xcf   : > { %234 = vst.msk [vmem:[%s734_s17 + $0x28] sm:$0xff] %vm228_vm6, %v225_v36 }
  0xd0   : > { %235 = vst.msk [vmem:[%s734_s17 + $0x30] sm:$0xff] %vm228_vm6, %v226_v37 }
  0xd1   : > { %236 = vst.msk [vmem:[%s734_s17 + $0x38] sm:$0xff] %vm228_vm6, %v227_v38 }
  0xd2   : > { %376 = vst.msk [vmem:[%s734_s17 + $0x40] sm:$0xff] %vm228_vm6, %v220_v29 }
  0xd3   : > { %377 = vst.msk [vmem:[%s734_s17 + $0x48] sm:$0xff] %vm228_vm6, %v221_v30 }
  0xd4   : > { %378 = vst.msk [vmem:[%s734_s17 + $0x50] sm:$0xff] %vm228_vm6, %v222_v31 }
  0xd5   : > { %379 = vst.msk [vmem:[%s734_s17 + $0x58] sm:$0xff] %vm228_vm6, %v223_v33 }
  0xd6   : > { %380 = vst.msk [vmem:[%s734_s17 + $0x60] sm:$0xff] %vm228_vm6, %v224_v35 }
  0xd7   : > { %381 = vst.msk [vmem:[%s734_s17 + $0x68] sm:$0xff] %vm228_vm6, %v225_v36 }
  0xd8   : > { %382 = vst.msk [vmem:[%s734_s17 + $0x70] sm:$0xff] %vm228_vm6, %v226_v37 }
  0xd9   : > { %383 = vst.msk [vmem:[%s734_s17 + $0x78] sm:$0xff] %vm228_vm6, %v227_v38 }
  0xda   : > { %384 = vst.msk [vmem:[%s734_s17 + $0x80] sm:$0xff] %vm228_vm6, %v220_v29 }
  0xdb   : > { %385 = vst.msk [vmem:[%s734_s17 + $0x88] sm:$0xff] %vm228_vm6, %v221_v30 }
  0xdc   : > { %386 = vst.msk [vmem:[%s734_s17 + $0x90] sm:$0xff] %vm228_vm6, %v222_v31 }
  0xdd   : > { %387 = vst.msk [vmem:[%s734_s17 + $0x98] sm:$0xff] %vm228_vm6, %v223_v33 }
  0xde   : > { %388 = vst.msk [vmem:[%s734_s17 + $0xa0] sm:$0xff] %vm228_vm6, %v224_v35 }
  0xdf   : > { %389 = vst.msk [vmem:[%s734_s17 + $0xa8] sm:$0xff] %vm228_vm6, %v225_v36 }
  0xe0   : > { %390 = vst.msk [vmem:[%s734_s17 + $0xb0] sm:$0xff] %vm228_vm6, %v226_v37 }
  0xe1   : > { %391 = vst.msk [vmem:[%s734_s17 + $0xb8] sm:$0xff] %vm228_vm6, %v227_v38 }
  0xe2   : > { %392 = vst.msk [vmem:[%s734_s17 + $0xc0] sm:$0xff] %vm228_vm6, %v220_v29 }
  0xe3   : > { %393 = vst.msk [vmem:[%s734_s17 + $0xc8] sm:$0xff] %vm228_vm6, %v221_v30 }
  0xe4   : > { %394 = vst.msk [vmem:[%s734_s17 + $0xd0] sm:$0xff] %vm228_vm6, %v222_v31 }
  0xe5   : > { %395 = vst.msk [vmem:[%s734_s17 + $0xd8] sm:$0xff] %vm228_vm6, %v223_v33 }
  0xe6   : > { %396 = vst.msk [vmem:[%s734_s17 + $0xe0] sm:$0xff] %vm228_vm6, %v224_v35 }
  0xe7   : > { %397 = vst.msk [vmem:[%s734_s17 + $0xe8] sm:$0xff] %vm228_vm6, %v225_v36 }
  0xe8   : > { %398 = vst.msk [vmem:[%s734_s17 + $0xf0] sm:$0xff] %vm228_vm6, %v226_v37 }
  0xe9   : > { %399 = vst.msk [vmem:[%s734_s17 + $0xf8] sm:$0xff] %vm228_vm6, %v227_v38 }
  0xea   : > { %548 = shalt.err (!%p545_p8)
}
  0xeb   : > { %s596_s4 = smov 128   ;;  %s597_s5 = smov 8  }
  0xec   : > { %417 = dma.vmem_to_hbm [thread:$0]  (%p665_p11), %s278_s13, 4096, %s280_s29, %s265_s30, %s596_s4, %s596_s4, %s597_s5  }
  0xed PF: > { %s294_s20 = sand.u32 1, %s579_s9   ;;  %p843_p9 = scmp.ge.s32.totalorder %s591_s12, 2 }
  0xee   : > { %s295_s14 = scalar_lea.sflag [#allocation4], %s294_s20 }
  0xef   : > { %p428_p10 = pnand %p843_p9, %p669_p12 }
  0xf1   : > { %p429_p1 = pneg %p428_p10 }
  0xf3   : > { %574 = dma.done.wait (%p429_p1), %s295_s14, 4096  }
  0xf4   : > { %576 = vsyncadd (%p429_p1), %s295_s14, 4294963200  ;;  %p16_p2 = scmp.ge.s32.totalorder %s638_s15, 4   ;;  %s844_s9 = smov %s583_s10 }
  0xf5   : > { %s845_s10 = smov %s587_s11  ;;  %s846_s11 = smov %s650_s18 }
  0xf6   : > { %s847_s12 = smov %s638_s15  ;;  %18 = sbr.rel (!%p16_p2) target bundleno = 6 (0x6), region = 81 }
  0xfb   :  { %301 = vsyncpa [#allocation3], 1 }
  0xfc   :  { %303 = vsyncpa [#allocation3 + $0x1], 1 }
  0xfd   :  { %304 = vsyncpa [#allocation4], 1 }
  0xfe   :  { %306 = vsyncpa [#allocation4 + $0x1], 1 }
  0xff   :  { %307 = vsyncpa [#allocation5], 1 }
 0x100   :  { %309 = vsyncpa [#allocation5 + $0x1], 1 }

</bundles_post_ra>
